<compile_context>
chip_gen: v6e
topology: v6e:2x2x1
jax: 0.10.0
libtpu: 0.0.40
codegen_flags: <defaults>
</compile_context>

<pallas_src>
import jax
import jax.numpy as jnp
from jax.experimental import pallas as pl
from jax.experimental.pallas import tpu as pltpu

NEG_SLOPE = 0.1
GN_EPS = 1e-5
NUM_GROUPS = 2


# --------------------------------------------------------------------------- kernel

def _qbasic_block_kernel(x_ref, m1_ref, m2_ref, m3_ref, sh_ref, sg_ref, aff_ref, o_ref):
    Bt, H, WCin = x_ref.shape
    WC = o_ref.shape[2]
    BH = Bt * H
    G = NUM_GROUPS
    n_per_group = float(H * WC // G)            # = H * W * (C // G)

    def shift_rows(a_bf, which):
        # Row shift by -1/+1 inside each sample (zero rows at the H boundary), done as
        # a 0/1 selector matmul on the idle MXU -> exact, no rolls / masked relayouts.
        return jnp.dot(sh_ref[which], a_bf,
                       preferred_element_type=jnp.float32).astype(jnp.bfloat16)

    def conv3x3(a_bf, m_ref):
        # a_bf: (BH, W*Ci) bf16 lane-dense rows; m_ref: (3, W*Ci, W*Co) banded dy-taps.
        acc = jnp.dot(a_bf, m_ref[1], preferred_element_type=jnp.float32)
        acc = acc + jnp.dot(shift_rows(a_bf, 0), m_ref[0],
                            preferred_element_type=jnp.float32)
        acc = acc + jnp.dot(shift_rows(a_bf, 1), m_ref[2],
                            preferred_element_type=jnp.float32)
        return acc                                          # (BH, W*Co) f32

    gmask0 = aff_ref[8:9, :]                                # (1, WC): 1.0 where group 0

    def group_norm(y, idx):
        # y: (BH, WC) f32; lane-dense gamma/beta at affine rows 2*idx / 2*idx+1.
        # Channel-group sums via constant 0/1 matmul (MXU), per-sample sum over H rows.
        s = jnp.dot(y, sg_ref[...], preferred_element_type=jnp.float32)        # (BH, G)
        ss = jnp.dot(y * y, sg_ref[...], preferred_element_type=jnp.float32)   # (BH, G)
        s_b = jnp.sum(s.reshape(Bt, H, G), axis=1)                             # (Bt, G)
        ss_b = jnp.sum(ss.reshape(Bt, H, G), axis=1)
        mu = s_b / n_per_group
        var = jnp.maximum(ss_b / n_per_group - mu * mu, 0.0)   # single-pass (f32)
        inv = jax.lax.rsqrt(var + GN_EPS)                      # (Bt, G)

        def lanes(v):                                          # (Bt, G) -> (Bt, 1, WC)
            return (v[:, 0:1] * gmask0 + v[:, 1:2] * (1.0 - gmask0))[:, None, :]

        scale = lanes(inv) * aff_ref[2 * idx:2 * idx + 1, :]
        shift = aff_ref[2 * idx + 1:2 * idx + 2, :] - lanes(mu) * scale
        return (y.reshape(Bt, H, WC) * scale + shift).reshape(BH, WC)

    def leaky(v):
        return jnp.where(v >= 0.0, v, NEG_SLOPE * v)

    x_bf = x_ref[...].reshape(BH, WCin)                     # bf16 lane-dense input rows

    # stage 1 + fused 1x1 shortcut: output columns [0, WC) = conv1, [WC, 2*WC) = shortcut
    mm1 = conv3x3(x_bf, m1_ref)                             # (BH, 2*WC) f32
    out1 = leaky(group_norm(mm1[:, :WC], 0))
    sc = group_norm(mm1[:, WC:], 3)

    out2 = leaky(group_norm(conv3x3(out1.astype(jnp.bfloat16), m2_ref), 1))
    out3 = group_norm(conv3x3(out2.astype(jnp.bfloat16), m3_ref), 2)

    o_ref[...] = (out3 + sc).reshape(Bt, H, WC)             # unmasked lane-dense store


# --------------------------------------------------------------------------- wrapper

def _banded3x3(w_oihw, Wd):
    """(O, I, 3, 3) -> (3, Wd*I, Wd*O): M[dy][wi*I+i, wo*O+o] = w[o,i,dy,wi-wo+1]."""
    O, I = int(w_oihw.shape[0]), int(w_oihw.shape[1])
    wi = jnp.arange(Wd)[:, None]
    wo = jnp.arange(Wd)[None, :]
    mats = []
    for dy in range(3):
        m = jnp.zeros((Wd, I, Wd, O), jnp.float32)
        for dx in range(3):
            sel = (wi - wo + 1 == dx).astype(jnp.float32)          # (Wd, Wd)
            blk = w_oihw[:, :, dy, dx].T.astype(jnp.float32)       # (I, O)
            m = m + sel[:, None, :, None] * blk[None, :, None, :]
        mats.append(m.reshape(Wd * I, Wd * O))
    return jnp.stack(mats)


def _banded1x1(w_oi11, Wd):
    """(O, I, 1, 1) -> (3, Wd*I, Wd*O) with the 1x1 conv on the center (dy=1) tap only."""
    wi = jnp.arange(Wd)[:, None]
    wo = jnp.arange(Wd)[None, :]
    sel = (wi == wo).astype(jnp.float32)
    blk = w_oi11[:, :, 0, 0].T.astype(jnp.float32)
    mc = (sel[:, None, :, None] * blk[None, :, None, :]).reshape(
        Wd * int(w_oi11.shape[1]), Wd * int(w_oi11.shape[0]))
    z = jnp.zeros_like(mc)
    return jnp.stack([z, mc, z])


def _shift_mats(Bt, H):
    """(2, Bt*H, Bt*H) 0/1 selectors: [0] -> row r-1 (zero at h=0), [1] -> row r+1."""
    r = jnp.arange(Bt * H)
    dn = ((r[:, None] - 1 == r[None, :]) & ((r % H) != 0)[:, None]).astype(jnp.float32)
    up = ((r[:, None] + 1 == r[None, :]) & ((r % H) != H - 1)[:, None]).astype(jnp.float32)
    return jnp.stack([dn, up]).astype(jnp.bfloat16)


def _pick_bt(B, bytes_per_sample, budget=8 << 20):
    """Largest batch tile that divides B, keeps >= 2 grid blocks, and fits the budget."""
    cap = max(1, budget // max(bytes_per_sample, 1))
    bt = 1
    for cand in range(1, B + 1):
        if B % cand or cand > cap:
            continue
        if B // cand >= 2 or B == 1:
            bt = cand
    return bt


def qbasic_block_rn12(x_nchw, params):
    """Forward pass of QBasicBlockRN12. x_nchw: (B, Cin, H, W) float32 (PyTorch layout)."""
    B, Cin, H, W = x_nchw.shape
    C = params["w1"].shape[0]
    assert C % NUM_GROUPS == 0, "GroupNorm(2) requires planes % 2 == 0"
    assert (W * C) % 128 == 0, "lane-dense layout assumes W*C a multiple of 128"
    assert H % 8 == 0, "sublane-dense layout assumes H a multiple of 8"

    WC = W * C
    WCin = W * Cin
    Bt = _pick_bt(B, bytes_per_sample=16 * H * WC * 4)
    grid = (B // Bt,)

    # ---- glue (plain JAX): lane-dense bf16 input, banded weights, GN constants ----
    x_ld = jnp.transpose(x_nchw, (0, 2, 3, 1)).reshape(B, H, WCin).astype(jnp.bfloat16)

    m1 = jnp.concatenate([_banded3x3(params["w1"], W),
                          _banded1x1(params["ws"], W)], axis=2).astype(jnp.bfloat16)
    m2 = _banded3x3(params["w2"], W).astype(jnp.bfloat16)          # (3, WC, WC)
    m3 = _banded3x3(params["w3"], W).astype(jnp.bfloat16)
    sh = _shift_mats(Bt, H)                                        # (2, Bt*H, Bt*H)

    ch = jnp.arange(WC, dtype=jnp.int32) % C
    gid = ch // (C // NUM_GROUPS)
    sg = (gid[:, None] == jnp.arange(NUM_GROUPS)[None, :]).astype(jnp.float32)  # (WC, G)

    lane = lambda v: jnp.tile(jnp.asarray(v, jnp.float32).reshape(1, C), (1, W))
    aff = jnp.concatenate([lane(params["g1"]), lane(params["b1"]),
                           lane(params["g2"]), lane(params["b2"]),
                           lane(params["g3"]), lane(params["b3"]),
                           lane(params["gs"]), lane(params["bs"]),
                           (gid == 0).astype(jnp.float32).reshape(1, WC)], axis=0)

    def cspec(shape):
        nd = len(shape)
        return pl.BlockSpec(shape, lambda b, _n=nd: (0,) * _n)

    out_ld = pl.pallas_call(
        _qbasic_block_kernel,
        out_shape=jax.ShapeDtypeStruct((B, H, WC), jnp.float32),
        grid_spec=pltpu.PrefetchScalarGridSpec(
            num_scalar_prefetch=0,
            grid=grid,
            in_specs=[pl.BlockSpec((Bt, H, WCin), lambda b: (b, 0, 0)),
                      cspec(m1.shape), cspec(m2.shape), cspec(m3.shape),
                      cspec(sh.shape), cspec(sg.shape), cspec(aff.shape)],
            out_specs=pl.BlockSpec((Bt, H, WC), lambda b: (b, 0, 0))),
        compiler_params=pltpu.CompilerParams(
            dimension_semantics=("parallel",),
            vmem_limit_bytes=32 * 1024 * 1024),
    )(x_ld, m1, m2, m3, sh, sg, aff)

    return jnp.transpose(out_ld.reshape(B, H, W, C), (0, 3, 1, 2))   # back to NCHW


# --------------------------------------------------------------------------- reference

def _reference(x, p):
    """Pure-JAX f32 reference (NCHW), mirrors the PyTorch forward."""
    def conv(x, w, pad):
        return jax.lax.conv_general_dilated(
            x, w, (1, 1), pad, dimension_numbers=("NCHW", "OIHW", "NCHW"))

    def gn(x, g, b):
        B, C, H, W = x.shape
        xg = x.reshape(B, NUM_GROUPS, C // NUM_GROUPS, H, W)
        mean = jnp.mean(xg, axis=(2, 3, 4), keepdims=True)
        var = jnp.mean((xg - mean) ** 2, axis=(2, 3, 4), keepdims=True)
        xn = ((xg - mean) / jnp.sqrt(var + GN_EPS)).reshape(B, C, H, W)
        return xn * g.reshape(1, C, 1, 1) + b.reshape(1, C, 1, 1)

    lrelu = lambda v: jnp.where(v >= 0, v, NEG_SLOPE * v)

    out = lrelu(gn(conv(x, p["w1"], "SAME"), p["g1"], p["b1"]))
    out = lrelu(gn(conv(out, p["w2"], "SAME"), p["g2"], p["b2"]))
    out = gn(conv(out, p["w3"], "SAME"), p["g3"], p["b3"])
    sc = gn(conv(x, p["ws"], "VALID"), p["gs"], p["bs"])
    return out + sc


def _init_params(key, in_planes, planes):
    ks = jax.random.split(key, 12)
    s3 = 1.0 / (in_planes * 9) ** 0.5
    s3p = 1.0 / (planes * 9) ** 0.5
    s1 = 1.0 / in_planes ** 0.5
    return {
        "w1": s3 * jax.random.normal(ks[0], (planes, in_planes, 3, 3), jnp.float32),
        "w2": s3p * jax.random.normal(ks[1], (planes, planes, 3, 3), jnp.float32),
        "w3": s3p * jax.random.normal(ks[2], (planes, planes, 3, 3), jnp.float32),
        "ws": s1 * jax.random.normal(ks[3], (planes, in_planes, 1, 1), jnp.float32),
        "g1": 1.0 + 0.1 * jax.random.normal(ks[4], (planes,), jnp.float32),
        "b1": 0.1 * jax.random.normal(ks[5], (planes,), jnp.float32),
        "g2": 1.0 + 0.1 * jax.random.normal(ks[6], (planes,), jnp.float32),
        "b2": 0.1 * jax.random.normal(ks[7], (planes,), jnp.float32),
        "g3": 1.0 + 0.1 * jax.random.normal(ks[8], (planes,), jnp.float32),
        "b3": 0.1 * jax.random.normal(ks[9], (planes,), jnp.float32),
        "gs": 1.0 + 0.1 * jax.random.normal(ks[10], (planes,), jnp.float32),
        "bs": 0.1 * jax.random.normal(ks[11], (planes,), jnp.float32),
    }


if __name__ == "__main__":
    key = jax.random.PRNGKey(0)
    kx, kp = jax.random.split(key)

    B, in_planes, planes, H, W = 2, 4, 8, 16, 16
    x = jax.random.normal(kx, (B, in_planes, H, W), jnp.float32)
    params = _init_params(kp, in_planes, planes)

    out = jax.block_until_ready(qbasic_block_rn12(x, params))
    ref = jax.block_until_ready(_reference(x, params))

    assert out.shape == (B, planes, H, W), out.shape
    # tolerance accounts for bf16 MXU operands (f32 accumulation) vs. the f32 reference;
    # three chained GN-normalized conv stages keep the error well below 5e-2.
    assert jnp.allclose(out, ref, atol=5e-2, rtol=5e-2), float(jnp.max(jnp.abs(out - ref)))

    print("KERNEL_OK")
</pallas_src>

<mosaic_0001>
module attributes {stable_mosaic.version = 11 : i64} {
  func.func @_qbasic_block_kernel(%arg0: i32, %arg1: memref<1x16x64xbf16, #tpu.memory_space<vmem>>, %arg2: memref<3x64x256xbf16, #tpu.memory_space<vmem>>, %arg3: memref<3x128x128xbf16, #tpu.memory_space<vmem>>, %arg4: memref<3x128x128xbf16, #tpu.memory_space<vmem>>, %arg5: memref<2x16x16xbf16, #tpu.memory_space<vmem>>, %arg6: memref<128x2xf32, #tpu.memory_space<vmem>>, %arg7: memref<9x128xf32, #tpu.memory_space<vmem>>, %arg8: memref<1x16x128xf32, #tpu.memory_space<vmem>>) attributes {dimension_semantics = [#tpu.dimension_semantics<parallel>], iteration_bounds = array<i64: 2>, scalar_prefetch = 0 : i64, scratch_operands = 0 : i64, tpu.core_type = #tpu.core_type<tc>, window_params = [{transform_indices = @transform_0, window_bounds = array<i64: 1, 16, 64>}, {pipeline_mode = #tpu.pipeline_mode<synchronous>, transform_indices = @transform_1, window_bounds = array<i64: 3, 64, 256>}, {pipeline_mode = #tpu.pipeline_mode<synchronous>, transform_indices = @transform_2, window_bounds = array<i64: 3, 128, 128>}, {pipeline_mode = #tpu.pipeline_mode<synchronous>, transform_indices = @transform_3, window_bounds = array<i64: 3, 128, 128>}, {pipeline_mode = #tpu.pipeline_mode<synchronous>, transform_indices = @transform_4, window_bounds = array<i64: 2, 16, 16>}, {pipeline_mode = #tpu.pipeline_mode<synchronous>, transform_indices = @transform_5, window_bounds = array<i64: 128, 2>}, {pipeline_mode = #tpu.pipeline_mode<synchronous>, transform_indices = @transform_6, window_bounds = array<i64: 9, 128>}, {transform_indices = @transform_7, window_bounds = array<i64: 1, 16, 128>}]} {
    %c8 = arith.constant 8 : index
    %c0 = arith.constant 0 : index
    %0 = vector.load %arg7[%c8, %c0] : memref<9x128xf32, #tpu.memory_space<vmem>>, vector<1x128xf32>
    %c0_0 = arith.constant 0 : index
    %c0_1 = arith.constant 0 : index
    %c0_2 = arith.constant 0 : index
    %1 = vector.load %arg1[%c0_0, %c0_1, %c0_2] : memref<1x16x64xbf16, #tpu.memory_space<vmem>>, vector<1x16x64xbf16>
    %2 = vector.shape_cast %1 : vector<1x16x64xbf16> to vector<16x64xbf16>
    %c1 = arith.constant 1 : index
    %c0_3 = arith.constant 0 : index
    %c0_4 = arith.constant 0 : index
    %3 = vector.load %arg2[%c1, %c0_3, %c0_4] : memref<3x64x256xbf16, #tpu.memory_space<vmem>>, vector<1x64x256xbf16>
    %4 = vector.shape_cast %3 : vector<1x64x256xbf16> to vector<64x256xbf16>
    %cst = arith.constant dense<0.000000e+00> : vector<16x256xf32>
    %5 = tpu.matmul %2, %4, %cst {dimension_numbers = #tpu.dot_dimension_numbers<[1], [0], [0], [1], [0, 0, 1, 1], [], []>} : vector<16x64xbf16>, vector<64x256xbf16>, vector<16x256xf32> -> vector<16x256xf32>
    %c0_5 = arith.constant 0 : index
    %c0_6 = arith.constant 0 : index
    %c0_7 = arith.constant 0 : index
    %6 = vector.load %arg5[%c0_5, %c0_6, %c0_7] : memref<2x16x16xbf16, #tpu.memory_space<vmem>>, vector<1x16x16xbf16>
    %7 = vector.shape_cast %6 : vector<1x16x16xbf16> to vector<16x16xbf16>
    %cst_8 = arith.constant dense<0.000000e+00> : vector<16x64xf32>
    %8 = tpu.matmul %7, %2, %cst_8 {dimension_numbers = #tpu.dot_dimension_numbers<[1], [0], [0], [1], [0, 0, 1, 1], [], []>} : vector<16x16xbf16>, vector<16x64xbf16>, vector<16x64xf32> -> vector<16x64xf32>
    %9 = arith.truncf %8 : vector<16x64xf32> to vector<16x64xbf16>
    %c0_9 = arith.constant 0 : index
    %c0_10 = arith.constant 0 : index
    %c0_11 = arith.constant 0 : index
    %10 = vector.load %arg2[%c0_9, %c0_10, %c0_11] : memref<3x64x256xbf16, #tpu.memory_space<vmem>>, vector<1x64x256xbf16>
    %11 = vector.shape_cast %10 : vector<1x64x256xbf16> to vector<64x256xbf16>
    %cst_12 = arith.constant dense<0.000000e+00> : vector<16x256xf32>
    %12 = tpu.matmul %9, %11, %cst_12 {dimension_numbers = #tpu.dot_dimension_numbers<[1], [0], [0], [1], [0, 0, 1, 1], [], []>} : vector<16x64xbf16>, vector<64x256xbf16>, vector<16x256xf32> -> vector<16x256xf32>
    %13 = arith.addf %5, %12 : vector<16x256xf32>
    %c1_13 = arith.constant 1 : index
    %c0_14 = arith.constant 0 : index
    %c0_15 = arith.constant 0 : index
    %14 = vector.load %arg5[%c1_13, %c0_14, %c0_15] : memref<2x16x16xbf16, #tpu.memory_space<vmem>>, vector<1x16x16xbf16>
    %15 = vector.shape_cast %14 : vector<1x16x16xbf16> to vector<16x16xbf16>
    %cst_16 = arith.constant dense<0.000000e+00> : vector<16x64xf32>
    %16 = tpu.matmul %15, %2, %cst_16 {dimension_numbers = #tpu.dot_dimension_numbers<[1], [0], [0], [1], [0, 0, 1, 1], [], []>} : vector<16x16xbf16>, vector<16x64xbf16>, vector<16x64xf32> -> vector<16x64xf32>
    %17 = arith.truncf %16 : vector<16x64xf32> to vector<16x64xbf16>
    %c2 = arith.constant 2 : index
    %c0_17 = arith.constant 0 : index
    %c0_18 = arith.constant 0 : index
    %18 = vector.load %arg2[%c2, %c0_17, %c0_18] : memref<3x64x256xbf16, #tpu.memory_space<vmem>>, vector<1x64x256xbf16>
    %19 = vector.shape_cast %18 : vector<1x64x256xbf16> to vector<64x256xbf16>
    %cst_19 = arith.constant dense<0.000000e+00> : vector<16x256xf32>
    %20 = tpu.matmul %17, %19, %cst_19 {dimension_numbers = #tpu.dot_dimension_numbers<[1], [0], [0], [1], [0, 0, 1, 1], [], []>} : vector<16x64xbf16>, vector<64x256xbf16>, vector<16x256xf32> -> vector<16x256xf32>
    %21 = arith.addf %13, %20 : vector<16x256xf32>
    %22 = vector.extract_strided_slice %21 {offsets = [0, 0], sizes = [16, 128], strides = [1, 1]} : vector<16x256xf32> to vector<16x128xf32>
    %c0_20 = arith.constant 0 : index
    %c0_21 = arith.constant 0 : index
    %23 = vector.load %arg6[%c0_20, %c0_21] : memref<128x2xf32, #tpu.memory_space<vmem>>, vector<128x2xf32>
    %cst_22 = arith.constant dense<0.000000e+00> : vector<16x2xf32>
    %24 = tpu.matmul %22, %23, %cst_22 {dimension_numbers = #tpu.dot_dimension_numbers<[1], [0], [0], [1], [0, 0, 1, 1], [], []>} : vector<16x128xf32>, vector<128x2xf32>, vector<16x2xf32> -> vector<16x2xf32>
    %25 = arith.mulf %22, %22 : vector<16x128xf32>
    %c0_23 = arith.constant 0 : index
    %c0_24 = arith.constant 0 : index
    %26 = vector.load %arg6[%c0_23, %c0_24] : memref<128x2xf32, #tpu.memory_space<vmem>>, vector<128x2xf32>
    %cst_25 = arith.constant dense<0.000000e+00> : vector<16x2xf32>
    %27 = tpu.matmul %25, %26, %cst_25 {dimension_numbers = #tpu.dot_dimension_numbers<[1], [0], [0], [1], [0, 0, 1, 1], [], []>} : vector<16x128xf32>, vector<128x2xf32>, vector<16x2xf32> -> vector<16x2xf32>
    %28 = vector.shape_cast %24 : vector<16x2xf32> to vector<1x16x2xf32>
    %cst_26 = arith.constant dense<0.000000e+00> : vector<1x2xf32>
    %29 = vector.multi_reduction <add>, %28, %cst_26 [1] : vector<1x16x2xf32> to vector<1x2xf32>
    %30 = vector.shape_cast %27 : vector<16x2xf32> to vector<1x16x2xf32>
    %cst_27 = arith.constant dense<0.000000e+00> : vector<1x2xf32>
    %31 = vector.multi_reduction <add>, %30, %cst_27 [1] : vector<1x16x2xf32> to vector<1x2xf32>
    %cst_28 = arith.constant 1.024000e+03 : f32
    %32 = vector.broadcast %cst_28 : f32 to vector<1x2xf32>
    %33 = arith.divf %29, %32 : vector<1x2xf32>
    %cst_29 = arith.constant 1.024000e+03 : f32
    %34 = vector.broadcast %cst_29 : f32 to vector<1x2xf32>
    %35 = arith.divf %31, %34 : vector<1x2xf32>
    %36 = arith.mulf %33, %33 : vector<1x2xf32>
    %37 = arith.subf %35, %36 : vector<1x2xf32>
    %cst_30 = arith.constant 0.000000e+00 : f32
    %38 = vector.broadcast %cst_30 : f32 to vector<1x2xf32>
    %39 = arith.maximumf %37, %38 : vector<1x2xf32>
    %cst_31 = arith.constant 9.99999974E-6 : f32
    %40 = vector.broadcast %cst_31 : f32 to vector<1x2xf32>
    %41 = arith.addf %39, %40 : vector<1x2xf32>
    %42 = math.rsqrt %41 : vector<1x2xf32>
    %43 = vector.extract_strided_slice %42 {offsets = [0, 0], sizes = [1, 1], strides = [1, 1]} : vector<1x2xf32> to vector<1x1xf32>
    %44 = vector.broadcast %43 : vector<1x1xf32> to vector<1x128xf32>
    %45 = arith.mulf %44, %0 : vector<1x128xf32>
    %46 = vector.extract_strided_slice %42 {offsets = [0, 1], sizes = [1, 1], strides = [1, 1]} : vector<1x2xf32> to vector<1x1xf32>
    %cst_32 = arith.constant 1.000000e+00 : f32
    %47 = vector.broadcast %cst_32 : f32 to vector<1x128xf32>
    %48 = arith.subf %47, %0 : vector<1x128xf32>
    %49 = vector.broadcast %46 : vector<1x1xf32> to vector<1x128xf32>
    %50 = arith.mulf %49, %48 : vector<1x128xf32>
    %51 = arith.addf %45, %50 : vector<1x128xf32>
    %52 = vector.shape_cast %51 : vector<1x128xf32> to vector<1x1x128xf32>
    %c0_33 = arith.constant 0 : index
    %c0_34 = arith.constant 0 : index
    %53 = vector.load %arg7[%c0_33, %c0_34] : memref<9x128xf32, #tpu.memory_space<vmem>>, vector<1x128xf32>
    %54 = vector.shape_cast %53 : vector<1x128xf32> to vector<1x1x128xf32>
    %55 = arith.mulf %52, %54 : vector<1x1x128xf32>
    %c1_35 = arith.constant 1 : index
    %c0_36 = arith.constant 0 : index
    %56 = vector.load %arg7[%c1_35, %c0_36] : memref<9x128xf32, #tpu.memory_space<vmem>>, vector<1x128xf32>
    %57 = vector.extract_strided_slice %33 {offsets = [0, 0], sizes = [1, 1], strides = [1, 1]} : vector<1x2xf32> to vector<1x1xf32>
    %58 = vector.broadcast %57 : vector<1x1xf32> to vector<1x128xf32>
    %59 = arith.mulf %58, %0 : vector<1x128xf32>
    %60 = vector.extract_strided_slice %33 {offsets = [0, 1], sizes = [1, 1], strides = [1, 1]} : vector<1x2xf32> to vector<1x1xf32>
    %cst_37 = arith.constant 1.000000e+00 : f32
    %61 = vector.broadcast %cst_37 : f32 to vector<1x128xf32>
    %62 = arith.subf %61, %0 : vector<1x128xf32>
    %63 = vector.broadcast %60 : vector<1x1xf32> to vector<1x128xf32>
    %64 = arith.mulf %63, %62 : vector<1x128xf32>
    %65 = arith.addf %59, %64 : vector<1x128xf32>
    %66 = vector.shape_cast %65 : vector<1x128xf32> to vector<1x1x128xf32>
    %67 = arith.mulf %66, %55 : vector<1x1x128xf32>
    %68 = vector.shape_cast %56 : vector<1x128xf32> to vector<1x1x128xf32>
    %69 = arith.subf %68, %67 : vector<1x1x128xf32>
    %70 = vector.shape_cast %22 : vector<16x128xf32> to vector<1x16x128xf32>
    %71 = vector.broadcast %55 : vector<1x1x128xf32> to vector<1x16x128xf32>
    %72 = arith.mulf %70, %71 : vector<1x16x128xf32>
    %73 = vector.broadcast %69 : vector<1x1x128xf32> to vector<1x16x128xf32>
    %74 = arith.addf %72, %73 : vector<1x16x128xf32>
    %75 = vector.shape_cast %74 : vector<1x16x128xf32> to vector<16x128xf32>
    %cst_38 = arith.constant 0.000000e+00 : f32
    %76 = vector.broadcast %cst_38 : f32 to vector<16x128xf32>
    %77 = arith.cmpf oge, %75, %76 : vector<16x128xf32>
    %cst_39 = arith.constant 1.000000e-01 : f32
    %78 = vector.broadcast %cst_39 : f32 to vector<16x128xf32>
    %79 = arith.mulf %78, %75 : vector<16x128xf32>
    %80 = arith.select %77, %75, %79 : vector<16x128xi1>, vector<16x128xf32>
    %81 = vector.extract_strided_slice %21 {offsets = [0, 128], sizes = [16, 128], strides = [1, 1]} : vector<16x256xf32> to vector<16x128xf32>
    %c0_40 = arith.constant 0 : index
    %c0_41 = arith.constant 0 : index
    %82 = vector.load %arg6[%c0_40, %c0_41] : memref<128x2xf32, #tpu.memory_space<vmem>>, vector<128x2xf32>
    %cst_42 = arith.constant dense<0.000000e+00> : vector<16x2xf32>
    %83 = tpu.matmul %81, %82, %cst_42 {dimension_numbers = #tpu.dot_dimension_numbers<[1], [0], [0], [1], [0, 0, 1, 1], [], []>} : vector<16x128xf32>, vector<128x2xf32>, vector<16x2xf32> -> vector<16x2xf32>
    %84 = arith.mulf %81, %81 : vector<16x128xf32>
    %c0_43 = arith.constant 0 : index
    %c0_44 = arith.constant 0 : index
    %85 = vector.load %arg6[%c0_43, %c0_44] : memref<128x2xf32, #tpu.memory_space<vmem>>, vector<128x2xf32>
    %cst_45 = arith.constant dense<0.000000e+00> : vector<16x2xf32>
    %86 = tpu.matmul %84, %85, %cst_45 {dimension_numbers = #tpu.dot_dimension_numbers<[1], [0], [0], [1], [0, 0, 1, 1], [], []>} : vector<16x128xf32>, vector<128x2xf32>, vector<16x2xf32> -> vector<16x2xf32>
    %87 = vector.shape_cast %83 : vector<16x2xf32> to vector<1x16x2xf32>
    %cst_46 = arith.constant dense<0.000000e+00> : vector<1x2xf32>
    %88 = vector.multi_reduction <add>, %87, %cst_46 [1] : vector<1x16x2xf32> to vector<1x2xf32>
    %89 = vector.shape_cast %86 : vector<16x2xf32> to vector<1x16x2xf32>
    %cst_47 = arith.constant dense<0.000000e+00> : vector<1x2xf32>
    %90 = vector.multi_reduction <add>, %89, %cst_47 [1] : vector<1x16x2xf32> to vector<1x2xf32>
    %cst_48 = arith.constant 1.024000e+03 : f32
    %91 = vector.broadcast %cst_48 : f32 to vector<1x2xf32>
    %92 = arith.divf %88, %91 : vector<1x2xf32>
    %cst_49 = arith.constant 1.024000e+03 : f32
    %93 = vector.broadcast %cst_49 : f32 to vector<1x2xf32>
    %94 = arith.divf %90, %93 : vector<1x2xf32>
    %95 = arith.mulf %92, %92 : vector<1x2xf32>
    %96 = arith.subf %94, %95 : vector<1x2xf32>
    %cst_50 = arith.constant 0.000000e+00 : f32
    %97 = vector.broadcast %cst_50 : f32 to vector<1x2xf32>
    %98 = arith.maximumf %96, %97 : vector<1x2xf32>
    %cst_51 = arith.constant 9.99999974E-6 : f32
    %99 = vector.broadcast %cst_51 : f32 to vector<1x2xf32>
    %100 = arith.addf %98, %99 : vector<1x2xf32>
    %101 = math.rsqrt %100 : vector<1x2xf32>
    %102 = vector.extract_strided_slice %101 {offsets = [0, 0], sizes = [1, 1], strides = [1, 1]} : vector<1x2xf32> to vector<1x1xf32>
    %103 = vector.broadcast %102 : vector<1x1xf32> to vector<1x128xf32>
    %104 = arith.mulf %103, %0 : vector<1x128xf32>
    %105 = vector.extract_strided_slice %101 {offsets = [0, 1], sizes = [1, 1], strides = [1, 1]} : vector<1x2xf32> to vector<1x1xf32>
    %cst_52 = arith.constant 1.000000e+00 : f32
    %106 = vector.broadcast %cst_52 : f32 to vector<1x128xf32>
    %107 = arith.subf %106, %0 : vector<1x128xf32>
    %108 = vector.broadcast %105 : vector<1x1xf32> to vector<1x128xf32>
    %109 = arith.mulf %108, %107 : vector<1x128xf32>
    %110 = arith.addf %104, %109 : vector<1x128xf32>
    %111 = vector.shape_cast %110 : vector<1x128xf32> to vector<1x1x128xf32>
    %c6 = arith.constant 6 : index
    %c0_53 = arith.constant 0 : index
    %112 = vector.load %arg7[%c6, %c0_53] : memref<9x128xf32, #tpu.memory_space<vmem>>, vector<1x128xf32>
    %113 = vector.shape_cast %112 : vector<1x128xf32> to vector<1x1x128xf32>
    %114 = arith.mulf %111, %113 : vector<1x1x128xf32>
    %c7 = arith.constant 7 : index
    %c0_54 = arith.constant 0 : index
    %115 = vector.load %arg7[%c7, %c0_54] : memref<9x128xf32, #tpu.memory_space<vmem>>, vector<1x128xf32>
    %116 = vector.extract_strided_slice %92 {offsets = [0, 0], sizes = [1, 1], strides = [1, 1]} : vector<1x2xf32> to vector<1x1xf32>
    %117 = vector.broadcast %116 : vector<1x1xf32> to vector<1x128xf32>
    %118 = arith.mulf %117, %0 : vector<1x128xf32>
    %119 = vector.extract_strided_slice %92 {offsets = [0, 1], sizes = [1, 1], strides = [1, 1]} : vector<1x2xf32> to vector<1x1xf32>
    %cst_55 = arith.constant 1.000000e+00 : f32
    %120 = vector.broadcast %cst_55 : f32 to vector<1x128xf32>
    %121 = arith.subf %120, %0 : vector<1x128xf32>
    %122 = vector.broadcast %119 : vector<1x1xf32> to vector<1x128xf32>
    %123 = arith.mulf %122, %121 : vector<1x128xf32>
    %124 = arith.addf %118, %123 : vector<1x128xf32>
    %125 = vector.shape_cast %124 : vector<1x128xf32> to vector<1x1x128xf32>
    %126 = arith.mulf %125, %114 : vector<1x1x128xf32>
    %127 = vector.shape_cast %115 : vector<1x128xf32> to vector<1x1x128xf32>
    %128 = arith.subf %127, %126 : vector<1x1x128xf32>
    %129 = vector.shape_cast %81 : vector<16x128xf32> to vector<1x16x128xf32>
    %130 = vector.broadcast %114 : vector<1x1x128xf32> to vector<1x16x128xf32>
    %131 = arith.mulf %129, %130 : vector<1x16x128xf32>
    %132 = vector.broadcast %128 : vector<1x1x128xf32> to vector<1x16x128xf32>
    %133 = arith.addf %131, %132 : vector<1x16x128xf32>
    %134 = vector.shape_cast %133 : vector<1x16x128xf32> to vector<16x128xf32>
    %135 = arith.truncf %80 : vector<16x128xf32> to vector<16x128xbf16>
    %c1_56 = arith.constant 1 : index
    %c0_57 = arith.constant 0 : index
    %c0_58 = arith.constant 0 : index
    %136 = vector.load %arg3[%c1_56, %c0_57, %c0_58] : memref<3x128x128xbf16, #tpu.memory_space<vmem>>, vector<1x128x128xbf16>
    %137 = vector.shape_cast %136 : vector<1x128x128xbf16> to vector<128x128xbf16>
    %cst_59 = arith.constant dense<0.000000e+00> : vector<16x128xf32>
    %138 = tpu.matmul %135, %137, %cst_59 {dimension_numbers = #tpu.dot_dimension_numbers<[1], [0], [0], [1], [0, 0, 1, 1], [], []>} : vector<16x128xbf16>, vector<128x128xbf16>, vector<16x128xf32> -> vector<16x128xf32>
    %c0_60 = arith.constant 0 : index
    %c0_61 = arith.constant 0 : index
    %c0_62 = arith.constant 0 : index
    %139 = vector.load %arg5[%c0_60, %c0_61, %c0_62] : memref<2x16x16xbf16, #tpu.memory_space<vmem>>, vector<1x16x16xbf16>
    %140 = vector.shape_cast %139 : vector<1x16x16xbf16> to vector<16x16xbf16>
    %cst_63 = arith.constant dense<0.000000e+00> : vector<16x128xf32>
    %141 = tpu.matmul %140, %135, %cst_63 {dimension_numbers = #tpu.dot_dimension_numbers<[1], [0], [0], [1], [0, 0, 1, 1], [], []>} : vector<16x16xbf16>, vector<16x128xbf16>, vector<16x128xf32> -> vector<16x128xf32>
    %142 = arith.truncf %141 : vector<16x128xf32> to vector<16x128xbf16>
    %c0_64 = arith.constant 0 : index
    %c0_65 = arith.constant 0 : index
    %c0_66 = arith.constant 0 : index
    %143 = vector.load %arg3[%c0_64, %c0_65, %c0_66] : memref<3x128x128xbf16, #tpu.memory_space<vmem>>, vector<1x128x128xbf16>
    %144 = vector.shape_cast %143 : vector<1x128x128xbf16> to vector<128x128xbf16>
    %cst_67 = arith.constant dense<0.000000e+00> : vector<16x128xf32>
    %145 = tpu.matmul %142, %144, %cst_67 {dimension_numbers = #tpu.dot_dimension_numbers<[1], [0], [0], [1], [0, 0, 1, 1], [], []>} : vector<16x128xbf16>, vector<128x128xbf16>, vector<16x128xf32> -> vector<16x128xf32>
    %146 = arith.addf %138, %145 : vector<16x128xf32>
    %c1_68 = arith.constant 1 : index
    %c0_69 = arith.constant 0 : index
    %c0_70 = arith.constant 0 : index
    %147 = vector.load %arg5[%c1_68, %c0_69, %c0_70] : memref<2x16x16xbf16, #tpu.memory_space<vmem>>, vector<1x16x16xbf16>
    %148 = vector.shape_cast %147 : vector<1x16x16xbf16> to vector<16x16xbf16>
    %cst_71 = arith.constant dense<0.000000e+00> : vector<16x128xf32>
    %149 = tpu.matmul %148, %135, %cst_71 {dimension_numbers = #tpu.dot_dimension_numbers<[1], [0], [0], [1], [0, 0, 1, 1], [], []>} : vector<16x16xbf16>, vector<16x128xbf16>, vector<16x128xf32> -> vector<16x128xf32>
    %150 = arith.truncf %149 : vector<16x128xf32> to vector<16x128xbf16>
    %c2_72 = arith.constant 2 : index
    %c0_73 = arith.constant 0 : index
    %c0_74 = arith.constant 0 : index
    %151 = vector.load %arg3[%c2_72, %c0_73, %c0_74] : memref<3x128x128xbf16, #tpu.memory_space<vmem>>, vector<1x128x128xbf16>
    %152 = vector.shape_cast %151 : vector<1x128x128xbf16> to vector<128x128xbf16>
    %cst_75 = arith.constant dense<0.000000e+00> : vector<16x128xf32>
    %153 = tpu.matmul %150, %152, %cst_75 {dimension_numbers = #tpu.dot_dimension_numbers<[1], [0], [0], [1], [0, 0, 1, 1], [], []>} : vector<16x128xbf16>, vector<128x128xbf16>, vector<16x128xf32> -> vector<16x128xf32>
    %154 = arith.addf %146, %153 : vector<16x128xf32>
    %c0_76 = arith.constant 0 : index
    %c0_77 = arith.constant 0 : index
    %155 = vector.load %arg6[%c0_76, %c0_77] : memref<128x2xf32, #tpu.memory_space<vmem>>, vector<128x2xf32>
    %cst_78 = arith.constant dense<0.000000e+00> : vector<16x2xf32>
    %156 = tpu.matmul %154, %155, %cst_78 {dimension_numbers = #tpu.dot_dimension_numbers<[1], [0], [0], [1], [0, 0, 1, 1], [], []>} : vector<16x128xf32>, vector<128x2xf32>, vector<16x2xf32> -> vector<16x2xf32>
    %157 = arith.mulf %154, %154 : vector<16x128xf32>
    %c0_79 = arith.constant 0 : index
    %c0_80 = arith.constant 0 : index
    %158 = vector.load %arg6[%c0_79, %c0_80] : memref<128x2xf32, #tpu.memory_space<vmem>>, vector<128x2xf32>
    %cst_81 = arith.constant dense<0.000000e+00> : vector<16x2xf32>
    %159 = tpu.matmul %157, %158, %cst_81 {dimension_numbers = #tpu.dot_dimension_numbers<[1], [0], [0], [1], [0, 0, 1, 1], [], []>} : vector<16x128xf32>, vector<128x2xf32>, vector<16x2xf32> -> vector<16x2xf32>
    %160 = vector.shape_cast %156 : vector<16x2xf32> to vector<1x16x2xf32>
    %cst_82 = arith.constant dense<0.000000e+00> : vector<1x2xf32>
    %161 = vector.multi_reduction <add>, %160, %cst_82 [1] : vector<1x16x2xf32> to vector<1x2xf32>
    %162 = vector.shape_cast %159 : vector<16x2xf32> to vector<1x16x2xf32>
    %cst_83 = arith.constant dense<0.000000e+00> : vector<1x2xf32>
    %163 = vector.multi_reduction <add>, %162, %cst_83 [1] : vector<1x16x2xf32> to vector<1x2xf32>
    %cst_84 = arith.constant 1.024000e+03 : f32
    %164 = vector.broadcast %cst_84 : f32 to vector<1x2xf32>
    %165 = arith.divf %161, %164 : vector<1x2xf32>
    %cst_85 = arith.constant 1.024000e+03 : f32
    %166 = vector.broadcast %cst_85 : f32 to vector<1x2xf32>
    %167 = arith.divf %163, %166 : vector<1x2xf32>
    %168 = arith.mulf %165, %165 : vector<1x2xf32>
    %169 = arith.subf %167, %168 : vector<1x2xf32>
    %cst_86 = arith.constant 0.000000e+00 : f32
    %170 = vector.broadcast %cst_86 : f32 to vector<1x2xf32>
    %171 = arith.maximumf %169, %170 : vector<1x2xf32>
    %cst_87 = arith.constant 9.99999974E-6 : f32
    %172 = vector.broadcast %cst_87 : f32 to vector<1x2xf32>
    %173 = arith.addf %171, %172 : vector<1x2xf32>
    %174 = math.rsqrt %173 : vector<1x2xf32>
    %175 = vector.extract_strided_slice %174 {offsets = [0, 0], sizes = [1, 1], strides = [1, 1]} : vector<1x2xf32> to vector<1x1xf32>
    %176 = vector.broadcast %175 : vector<1x1xf32> to vector<1x128xf32>
    %177 = arith.mulf %176, %0 : vector<1x128xf32>
    %178 = vector.extract_strided_slice %174 {offsets = [0, 1], sizes = [1, 1], strides = [1, 1]} : vector<1x2xf32> to vector<1x1xf32>
    %cst_88 = arith.constant 1.000000e+00 : f32
    %179 = vector.broadcast %cst_88 : f32 to vector<1x128xf32>
    %180 = arith.subf %179, %0 : vector<1x128xf32>
    %181 = vector.broadcast %178 : vector<1x1xf32> to vector<1x128xf32>
    %182 = arith.mulf %181, %180 : vector<1x128xf32>
    %183 = arith.addf %177, %182 : vector<1x128xf32>
    %184 = vector.shape_cast %183 : vector<1x128xf32> to vector<1x1x128xf32>
    %c2_89 = arith.constant 2 : index
    %c0_90 = arith.constant 0 : index
    %185 = vector.load %arg7[%c2_89, %c0_90] : memref<9x128xf32, #tpu.memory_space<vmem>>, vector<1x128xf32>
    %186 = vector.shape_cast %185 : vector<1x128xf32> to vector<1x1x128xf32>
    %187 = arith.mulf %184, %186 : vector<1x1x128xf32>
    %c3 = arith.constant 3 : index
    %c0_91 = arith.constant 0 : index
    %188 = vector.load %arg7[%c3, %c0_91] : memref<9x128xf32, #tpu.memory_space<vmem>>, vector<1x128xf32>
    %189 = vector.extract_strided_slice %165 {offsets = [0, 0], sizes = [1, 1], strides = [1, 1]} : vector<1x2xf32> to vector<1x1xf32>
    %190 = vector.broadcast %189 : vector<1x1xf32> to vector<1x128xf32>
    %191 = arith.mulf %190, %0 : vector<1x128xf32>
    %192 = vector.extract_strided_slice %165 {offsets = [0, 1], sizes = [1, 1], strides = [1, 1]} : vector<1x2xf32> to vector<1x1xf32>
    %cst_92 = arith.constant 1.000000e+00 : f32
    %193 = vector.broadcast %cst_92 : f32 to vector<1x128xf32>
    %194 = arith.subf %193, %0 : vector<1x128xf32>
    %195 = vector.broadcast %192 : vector<1x1xf32> to vector<1x128xf32>
    %196 = arith.mulf %195, %194 : vector<1x128xf32>
    %197 = arith.addf %191, %196 : vector<1x128xf32>
    %198 = vector.shape_cast %197 : vector<1x128xf32> to vector<1x1x128xf32>
    %199 = arith.mulf %198, %187 : vector<1x1x128xf32>
    %200 = vector.shape_cast %188 : vector<1x128xf32> to vector<1x1x128xf32>
    %201 = arith.subf %200, %199 : vector<1x1x128xf32>
    %202 = vector.shape_cast %154 : vector<16x128xf32> to vector<1x16x128xf32>
    %203 = vector.broadcast %187 : vector<1x1x128xf32> to vector<1x16x128xf32>
    %204 = arith.mulf %202, %203 : vector<1x16x128xf32>
    %205 = vector.broadcast %201 : vector<1x1x128xf32> to vector<1x16x128xf32>
    %206 = arith.addf %204, %205 : vector<1x16x128xf32>
    %207 = vector.shape_cast %206 : vector<1x16x128xf32> to vector<16x128xf32>
    %cst_93 = arith.constant 0.000000e+00 : f32
    %208 = vector.broadcast %cst_93 : f32 to vector<16x128xf32>
    %209 = arith.cmpf oge, %207, %208 : vector<16x128xf32>
    %cst_94 = arith.constant 1.000000e-01 : f32
    %210 = vector.broadcast %cst_94 : f32 to vector<16x128xf32>
    %211 = arith.mulf %210, %207 : vector<16x128xf32>
    %212 = arith.select %209, %207, %211 : vector<16x128xi1>, vector<16x128xf32>
    %213 = arith.truncf %212 : vector<16x128xf32> to vector<16x128xbf16>
    %c1_95 = arith.constant 1 : index
    %c0_96 = arith.constant 0 : index
    %c0_97 = arith.constant 0 : index
    %214 = vector.load %arg4[%c1_95, %c0_96, %c0_97] : memref<3x128x128xbf16, #tpu.memory_space<vmem>>, vector<1x128x128xbf16>
    %215 = vector.shape_cast %214 : vector<1x128x128xbf16> to vector<128x128xbf16>
    %cst_98 = arith.constant dense<0.000000e+00> : vector<16x128xf32>
    %216 = tpu.matmul %213, %215, %cst_98 {dimension_numbers = #tpu.dot_dimension_numbers<[1], [0], [0], [1], [0, 0, 1, 1], [], []>} : vector<16x128xbf16>, vector<128x128xbf16>, vector<16x128xf32> -> vector<16x128xf32>
    %c0_99 = arith.constant 0 : index
    %c0_100 = arith.constant 0 : index
    %c0_101 = arith.constant 0 : index
    %217 = vector.load %arg5[%c0_99, %c0_100, %c0_101] : memref<2x16x16xbf16, #tpu.memory_space<vmem>>, vector<1x16x16xbf16>
    %218 = vector.shape_cast %217 : vector<1x16x16xbf16> to vector<16x16xbf16>
    %cst_102 = arith.constant dense<0.000000e+00> : vector<16x128xf32>
    %219 = tpu.matmul %218, %213, %cst_102 {dimension_numbers = #tpu.dot_dimension_numbers<[1], [0], [0], [1], [0, 0, 1, 1], [], []>} : vector<16x16xbf16>, vector<16x128xbf16>, vector<16x128xf32> -> vector<16x128xf32>
    %220 = arith.truncf %219 : vector<16x128xf32> to vector<16x128xbf16>
    %c0_103 = arith.constant 0 : index
    %c0_104 = arith.constant 0 : index
    %c0_105 = arith.constant 0 : index
    %221 = vector.load %arg4[%c0_103, %c0_104, %c0_105] : memref<3x128x128xbf16, #tpu.memory_space<vmem>>, vector<1x128x128xbf16>
    %222 = vector.shape_cast %221 : vector<1x128x128xbf16> to vector<128x128xbf16>
    %cst_106 = arith.constant dense<0.000000e+00> : vector<16x128xf32>
    %223 = tpu.matmul %220, %222, %cst_106 {dimension_numbers = #tpu.dot_dimension_numbers<[1], [0], [0], [1], [0, 0, 1, 1], [], []>} : vector<16x128xbf16>, vector<128x128xbf16>, vector<16x128xf32> -> vector<16x128xf32>
    %224 = arith.addf %216, %223 : vector<16x128xf32>
    %c1_107 = arith.constant 1 : index
    %c0_108 = arith.constant 0 : index
    %c0_109 = arith.constant 0 : index
    %225 = vector.load %arg5[%c1_107, %c0_108, %c0_109] : memref<2x16x16xbf16, #tpu.memory_space<vmem>>, vector<1x16x16xbf16>
    %226 = vector.shape_cast %225 : vector<1x16x16xbf16> to vector<16x16xbf16>
    %cst_110 = arith.constant dense<0.000000e+00> : vector<16x128xf32>
    %227 = tpu.matmul %226, %213, %cst_110 {dimension_numbers = #tpu.dot_dimension_numbers<[1], [0], [0], [1], [0, 0, 1, 1], [], []>} : vector<16x16xbf16>, vector<16x128xbf16>, vector<16x128xf32> -> vector<16x128xf32>
    %228 = arith.truncf %227 : vector<16x128xf32> to vector<16x128xbf16>
    %c2_111 = arith.constant 2 : index
    %c0_112 = arith.constant 0 : index
    %c0_113 = arith.constant 0 : index
    %229 = vector.load %arg4[%c2_111, %c0_112, %c0_113] : memref<3x128x128xbf16, #tpu.memory_space<vmem>>, vector<1x128x128xbf16>
    %230 = vector.shape_cast %229 : vector<1x128x128xbf16> to vector<128x128xbf16>
    %cst_114 = arith.constant dense<0.000000e+00> : vector<16x128xf32>
    %231 = tpu.matmul %228, %230, %cst_114 {dimension_numbers = #tpu.dot_dimension_numbers<[1], [0], [0], [1], [0, 0, 1, 1], [], []>} : vector<16x128xbf16>, vector<128x128xbf16>, vector<16x128xf32> -> vector<16x128xf32>
    %232 = arith.addf %224, %231 : vector<16x128xf32>
    %c0_115 = arith.constant 0 : index
    %c0_116 = arith.constant 0 : index
    %233 = vector.load %arg6[%c0_115, %c0_116] : memref<128x2xf32, #tpu.memory_space<vmem>>, vector<128x2xf32>
    %cst_117 = arith.constant dense<0.000000e+00> : vector<16x2xf32>
    %234 = tpu.matmul %232, %233, %cst_117 {dimension_numbers = #tpu.dot_dimension_numbers<[1], [0], [0], [1], [0, 0, 1, 1], [], []>} : vector<16x128xf32>, vector<128x2xf32>, vector<16x2xf32> -> vector<16x2xf32>
    %235 = arith.mulf %232, %232 : vector<16x128xf32>
    %c0_118 = arith.constant 0 : index
    %c0_119 = arith.constant 0 : index
    %236 = vector.load %arg6[%c0_118, %c0_119] : memref<128x2xf32, #tpu.memory_space<vmem>>, vector<128x2xf32>
    %cst_120 = arith.constant dense<0.000000e+00> : vector<16x2xf32>
    %237 = tpu.matmul %235, %236, %cst_120 {dimension_numbers = #tpu.dot_dimension_numbers<[1], [0], [0], [1], [0, 0, 1, 1], [], []>} : vector<16x128xf32>, vector<128x2xf32>, vector<16x2xf32> -> vector<16x2xf32>
    %238 = vector.shape_cast %234 : vector<16x2xf32> to vector<1x16x2xf32>
    %cst_121 = arith.constant dense<0.000000e+00> : vector<1x2xf32>
    %239 = vector.multi_reduction <add>, %238, %cst_121 [1] : vector<1x16x2xf32> to vector<1x2xf32>
    %240 = vector.shape_cast %237 : vector<16x2xf32> to vector<1x16x2xf32>
    %cst_122 = arith.constant dense<0.000000e+00> : vector<1x2xf32>
    %241 = vector.multi_reduction <add>, %240, %cst_122 [1] : vector<1x16x2xf32> to vector<1x2xf32>
    %cst_123 = arith.constant 1.024000e+03 : f32
    %242 = vector.broadcast %cst_123 : f32 to vector<1x2xf32>
    %243 = arith.divf %239, %242 : vector<1x2xf32>
    %cst_124 = arith.constant 1.024000e+03 : f32
    %244 = vector.broadcast %cst_124 : f32 to vector<1x2xf32>
    %245 = arith.divf %241, %244 : vector<1x2xf32>
    %246 = arith.mulf %243, %243 : vector<1x2xf32>
    %247 = arith.subf %245, %246 : vector<1x2xf32>
    %cst_125 = arith.constant 0.000000e+00 : f32
    %248 = vector.broadcast %cst_125 : f32 to vector<1x2xf32>
    %249 = arith.maximumf %247, %248 : vector<1x2xf32>
    %cst_126 = arith.constant 9.99999974E-6 : f32
    %250 = vector.broadcast %cst_126 : f32 to vector<1x2xf32>
    %251 = arith.addf %249, %250 : vector<1x2xf32>
    %252 = math.rsqrt %251 : vector<1x2xf32>
    %253 = vector.extract_strided_slice %252 {offsets = [0, 0], sizes = [1, 1], strides = [1, 1]} : vector<1x2xf32> to vector<1x1xf32>
    %254 = vector.broadcast %253 : vector<1x1xf32> to vector<1x128xf32>
    %255 = arith.mulf %254, %0 : vector<1x128xf32>
    %256 = vector.extract_strided_slice %252 {offsets = [0, 1], sizes = [1, 1], strides = [1, 1]} : vector<1x2xf32> to vector<1x1xf32>
    %cst_127 = arith.constant 1.000000e+00 : f32
    %257 = vector.broadcast %cst_127 : f32 to vector<1x128xf32>
    %258 = arith.subf %257, %0 : vector<1x128xf32>
    %259 = vector.broadcast %256 : vector<1x1xf32> to vector<1x128xf32>
    %260 = arith.mulf %259, %258 : vector<1x128xf32>
    %261 = arith.addf %255, %260 : vector<1x128xf32>
    %262 = vector.shape_cast %261 : vector<1x128xf32> to vector<1x1x128xf32>
    %c4 = arith.constant 4 : index
    %c0_128 = arith.constant 0 : index
    %263 = vector.load %arg7[%c4, %c0_128] : memref<9x128xf32, #tpu.memory_space<vmem>>, vector<1x128xf32>
    %264 = vector.shape_cast %263 : vector<1x128xf32> to vector<1x1x128xf32>
    %265 = arith.mulf %262, %264 : vector<1x1x128xf32>
    %c5 = arith.constant 5 : index
    %c0_129 = arith.constant 0 : index
    %266 = vector.load %arg7[%c5, %c0_129] : memref<9x128xf32, #tpu.memory_space<vmem>>, vector<1x128xf32>
    %267 = vector.extract_strided_slice %243 {offsets = [0, 0], sizes = [1, 1], strides = [1, 1]} : vector<1x2xf32> to vector<1x1xf32>
    %268 = vector.broadcast %267 : vector<1x1xf32> to vector<1x128xf32>
    %269 = arith.mulf %268, %0 : vector<1x128xf32>
    %270 = vector.extract_strided_slice %243 {offsets = [0, 1], sizes = [1, 1], strides = [1, 1]} : vector<1x2xf32> to vector<1x1xf32>
    %cst_130 = arith.constant 1.000000e+00 : f32
    %271 = vector.broadcast %cst_130 : f32 to vector<1x128xf32>
    %272 = arith.subf %271, %0 : vector<1x128xf32>
    %273 = vector.broadcast %270 : vector<1x1xf32> to vector<1x128xf32>
    %274 = arith.mulf %273, %272 : vector<1x128xf32>
    %275 = arith.addf %269, %274 : vector<1x128xf32>
    %276 = vector.shape_cast %275 : vector<1x128xf32> to vector<1x1x128xf32>
    %277 = arith.mulf %276, %265 : vector<1x1x128xf32>
    %278 = vector.shape_cast %266 : vector<1x128xf32> to vector<1x1x128xf32>
    %279 = arith.subf %278, %277 : vector<1x1x128xf32>
    %280 = vector.shape_cast %232 : vector<16x128xf32> to vector<1x16x128xf32>
    %281 = vector.broadcast %265 : vector<1x1x128xf32> to vector<1x16x128xf32>
    %282 = arith.mulf %280, %281 : vector<1x16x128xf32>
    %283 = vector.broadcast %279 : vector<1x1x128xf32> to vector<1x16x128xf32>
    %284 = arith.addf %282, %283 : vector<1x16x128xf32>
    %285 = vector.shape_cast %284 : vector<1x16x128xf32> to vector<16x128xf32>
    %286 = arith.addf %285, %134 : vector<16x128xf32>
    %287 = vector.shape_cast %286 : vector<16x128xf32> to vector<1x16x128xf32>
    %c0_131 = arith.constant 0 : index
    %c0_132 = arith.constant 0 : index
    %c0_133 = arith.constant 0 : index
    %288 = vector.load %arg8[%c0_131, %c0_132, %c0_133] : memref<1x16x128xf32, #tpu.memory_space<vmem>>, vector<1x16x128xf32>
    tpu.vector_store %arg8[%c0_131, %c0_132, %c0_133], %287 {strides = array<i32>} : memref<1x16x128xf32, #tpu.memory_space<vmem>>, vector<1x16x128xf32>,
    return
  }
  func.func @transform_0(%arg0: i32) -> (i32, i32, i32) {
    %c0_i32 = arith.constant 0 : i32
    %c0_i32_0 = arith.constant 0 : i32
    %c0_i32_1 = arith.constant 0 : i32
    return %arg0, %c0_i32, %c0_i32_0 : i32, i32, i32
  }
  func.func @transform_1(%arg0: i32) -> (i32, i32, i32) {
    %c0_i32 = arith.constant 0 : i32
    %c0_i32_0 = arith.constant 0 : i32
    %c0_i32_1 = arith.constant 0 : i32
    %c0_i32_2 = arith.constant 0 : i32
    return %c0_i32, %c0_i32_0, %c0_i32_1 : i32, i32, i32
  }
  func.func @transform_2(%arg0: i32) -> (i32, i32, i32) {
    %c0_i32 = arith.constant 0 : i32
    %c0_i32_0 = arith.constant 0 : i32
    %c0_i32_1 = arith.constant 0 : i32
    %c0_i32_2 = arith.constant 0 : i32
    return %c0_i32, %c0_i32_0, %c0_i32_1 : i32, i32, i32
  }
  func.func @transform_3(%arg0: i32) -> (i32, i32, i32) {
    %c0_i32 = arith.constant 0 : i32
    %c0_i32_0 = arith.constant 0 : i32
    %c0_i32_1 = arith.constant 0 : i32
    %c0_i32_2 = arith.constant 0 : i32
    return %c0_i32, %c0_i32_0, %c0_i32_1 : i32, i32, i32
  }
  func.func @transform_4(%arg0: i32) -> (i32, i32, i32) {
    %c0_i32 = arith.constant 0 : i32
    %c0_i32_0 = arith.constant 0 : i32
    %c0_i32_1 = arith.constant 0 : i32
    %c0_i32_2 = arith.constant 0 : i32
    return %c0_i32, %c0_i32_0, %c0_i32_1 : i32, i32, i32
  }
  func.func @transform_5(%arg0: i32) -> (i32, i32) {
    %c0_i32 = arith.constant 0 : i32
    %c0_i32_0 = arith.constant 0 : i32
    %c0_i32_1 = arith.constant 0 : i32
    return %c0_i32, %c0_i32_0 : i32, i32
  }
  func.func @transform_6(%arg0: i32) -> (i32, i32) {
    %c0_i32 = arith.constant 0 : i32
    %c0_i32_0 = arith.constant 0 : i32
    %c0_i32_1 = arith.constant 0 : i32
    return %c0_i32, %c0_i32_0 : i32, i32
  }
  func.func @transform_7(%arg0: i32) -> (i32, i32, i32) {
    %c0_i32 = arith.constant 0 : i32
    %c0_i32_0 = arith.constant 0 : i32
    %c0_i32_1 = arith.constant 0 : i32
    return %arg0, %c0_i32, %c0_i32_0 : i32, i32, i32
  }
}

</mosaic_0001>

<bundles_post_ra>
// kernel: tpu_custom_call.1
= control target key start
LH: loop header
LB: loop body
LE: loop exit
PB: predicated region body
PF: predicated region fallthrough
CT: control target
= control target key end

     0   :  { %12 = vsyncpa [#allocation3], 0  ;;  %s4556_s0 = inlined_call_operand.vmem [shape: bf16[2,16,64], index: 0, kind: input, shape index: {}]   ;;  %s4557_s1 = inlined_call_operand.hbm [shape: bf16[3,64,256], index: 1, kind: input, shape index: {}]   ;;  %s4558_s2 = inlined_call_operand.hbm [shape: bf16[3,128,128], index: 2, kind: input, shape index: {}]   ;;  %s4559_s3 = inlined_call_operand.hbm [shape: bf16[3,128,128], index: 3, kind: input, shape index: {}]   ;;  %s4560_s4 = inlined_call_operand.vmem [shape: bf16[2,16,16], index: 4, kind: input, shape index: {}]   ;;  %s4561_s5 = inlined_call_operand.vmem [shape: f32[128,2], index: 5, kind: input, shape index: {}]   ;;  %s4562_s6 = inlined_call_operand.vmem [shape: f32[9,128], index: 6, kind: input, shape index: {}]   ;;  %s4563_s7 = inlined_call_operand.hbm [shape: f32[2,16,128], index: 7, kind: output, shape index: {}]  }
   0x1   :  { %13 = vsyncpa [#allocation6], 0 }
   0x2   :  { %14 = vsyncpa [#allocation4], 0 }
   0x3   :  { %16 = vsyncpa [#allocation4 + $0x1], 0  ;;  %s3700_s24 = smov 0   ;;  %s3702_s25 = smov 0  }
   0x4   :  { %s3704_s26 = smov 0   ;;  %s3706_s27 = smov 0  }
   0x5 LB: > { %s3721_s28 = sadd.s32 4294967295, %s3644_s27   ;;  %s2548_s29 = sadd.s32 4294967294, %s3644_s27   ;;  %s3644_s27 = sphi %s3706_s27, %s4571_s27   ;;  %s3640_s26 = sphi %s3704_s26, %s4570_s26   ;;  %s3636_s25 = sphi %s3702_s25, %s4569_s25   ;;  %s3632_s24 = sphi %s3700_s24, %s4568_s24  }
   0x6   : > { %s3725_s30 = sadd.s32 1, %s3644_s27   ;;  %s181_s8 = sadd.s32 1, %s3640_s26 }
   0x7   : > { %s178_s9 = ssub.s32 %s3644_s27, %s3725_s30  ;;  %p191_p0 = scmp.ne.s32.totalorder %s3640_s26, %s3636_s25 }
   0x8   : > { %p179_p1 = scmp.eq.s32.totalorder %s178_s9, 0  ;;  %p192_p2 = scmp.eq.s32.totalorder %s3721_s28, 1 }
   0x9   : > { %p197_p3 = scmp.ne.s32.totalorder %s3636_s25, %s3632_s24  ;;  %p198_p4 = scmp.eq.s32.totalorder %s2548_s29, 1 }
   0xa   : > { %s3736_s10 = scalar_select %p179_p1, %s3640_s26, %s181_s8  }
   0xb   : > { %p3738_p5 = por %p192_p2, %p191_p0  ;;  %p3742_p6 = por %p198_p4, %p197_p3 }
   0xc   : > { %p2549_p7 = scmp.ge.s32.totalorder %s3644_s27, 1  ;;  %p205_p8 = scmp.lt.s32.totalorder %s3644_s27, 3 }
   0xd   : > { %p3328_p9 = scmp.eq.s32.totalorder %s3721_s28, 0  ;;  %s3646_s14 = smov [#allocation5]  }
   0xe   : > { %p3749_p10 = pnand %p2549_p7, %p205_p8  ;;  %s230_s15 = sshll.u32 %s3646_s14, 4  ;;  %s231_s15 = int_to_ptr.vmem [resolvable:$true] %s230_s15 }
   0xf   : > { %s3647_s17 = smov [#allocation2]   ;;  %s3509_s19 = scalar_lea.vmem %s231_s15, 3072 }
  0x10   : > { %p3314_p11 = pneg %p3749_p10  ;;  %s217_s18 = sshll.u32 %s3647_s17, 4  ;;  %s218_s18 = int_to_ptr.vmem [resolvable:$true] %s217_s18 }
  0x11   : > { %p3510_p0 = scmp.ne.s32.totalorder %s231_s15, %s3509_s19  ;;  %p3517_p3 = scmp.lt.s32.totalorder %s231_s15, %s231_s15 }
  0x12   : > { %p3757_p12 = pnand %p3328_p9, %p3314_p11  ;;  %p3518_p4 = scmp.lt.s32.totalorder %s3509_s19, %s3509_s19 }
  0x14   : > { %p3500_p13 = pneg %p3757_p12  ;;  %p3519_p7 = por %p3518_p4, %p3517_p3 }
  0x16   : > { %p3512_p1 = pnand %p3510_p0, %p3500_p13 }
  0x18   : > { %p3513_p2 = pneg %p3512_p1 }
  0x1a   : > { %p3520_p8 = pnand %p3519_p7, %p3513_p2 }
  0x1c   : > { %3523 = shalt.err (!%p3520_p8)
}
  0x1d   : > { %s3648_s20 = smov 64   ;;  %s3649_s21 = smov 4  }
  0x1e   : > { %3320 = dma.hbm_to_vmem [thread:$0]  (!%p3757_p12), %s4558_s2, 3072, %s231_s15, [#allocation6], %s3648_s20, %s3648_s20, %s3649_s21  }
  0x1f   : > { %s3535_s29 = scalar_lea.vmem %s218_s18, 3072  ;;  %p3543_p2 = scmp.lt.s32.totalorder %s218_s18, %s218_s18 }
  0x20   : > { %p3536_p11 = scmp.ne.s32.totalorder %s218_s18, %s3535_s29  ;;  %p3544_p3 = scmp.lt.s32.totalorder %s3535_s29, %s3535_s29 }
  0x22   : > { %p3538_p0 = pnand %p3536_p11, %p3500_p13  ;;  %p3545_p4 = por %p3544_p3, %p3543_p2 }
  0x24   : > { %p3539_p1 = pneg %p3538_p0 }
  0x26   : > { %p3546_p7 = pnand %p3545_p4, %p3539_p1 }
  0x28   : > { %3549 = shalt.err (!%p3546_p7)
}
  0x29   : > { %s3650_s8 = smov 128   ;;  %s3651_s9 = smov 8  }
  0x2a   : > { %3317 = dma.hbm_to_vmem [thread:$0]  (!%p3757_p12), %s4557_s1, 3072, %s218_s18, [#allocation3], %s3650_s8, %s3650_s8, %s3651_s9  }
  0x2b   : > { %s3652_s15 = smov [#allocation7]  }
  0x2c   : > { %s243_s19 = sshll.u32 %s3652_s15, 4  ;;  %s244_s19 = int_to_ptr.vmem [resolvable:$true] %s243_s19 }
  0x2d   : > { %s3561_s22 = scalar_lea.vmem %s244_s19, 3072  ;;  %p3569_p1 = scmp.lt.s32.totalorder %s244_s19, %s244_s19 }
  0x2e   : > { %p3562_p8 = scmp.ne.s32.totalorder %s244_s19, %s3561_s22  ;;  %p3570_p2 = scmp.lt.s32.totalorder %s3561_s22, %s3561_s22 }
  0x30   : > { %p3564_p11 = pnand %p3562_p8, %p3500_p13  ;;  %p3571_p3 = por %p3570_p2, %p3569_p1 }
  0x32   : > { %p3565_p0 = pneg %p3564_p11 }
  0x34   : > { %p3572_p4 = pnand %p3571_p3, %p3565_p0 }
  0x36   : > { %3575 = shalt.err (!%p3572_p4)
}
  0x37   : > { %3323 = dma.hbm_to_vmem [thread:$0]  (!%p3757_p12), %s4559_s3, 3072, %s244_s19, [#allocation6], %s3648_s20, %s3648_s20, %s3649_s21  }
  0x38   : > { %276 = sbr.rel (%p3749_p10) target bundleno = 2863 (0xb2f), region = 48 }
  0x3d   : > { %3619 = dma.done.wait (%p3328_p9), [#allocation3], 3072  }
  0x3e   : > { %3621 = vsyncadd (%p3328_p9), [#allocation3], 4294964224 }
  0x3f   : > { %3623 = dma.done.wait (%p3328_p9), [#allocation6], 6144  }
  0x40   : > { %3625 = vsyncadd (%p3328_p9), [#allocation6], 4294961152  ;;  %p316_p13 = scmp.lt.s32.totalorder %s3721_s28, 1  ;;  %v3653_v0 = vmov 0.0   ;;  %vm3654_vm0 = vmmov 0   ;;  %v3655_v1 = vmov 0  }
  0x41   : > { %2864 = vmatprep.subr.bf16.mxu0 %v3653_v0  ;;  %2866 = vmatprep.mubr.msk.bf16.mxu0 %vm3654_vm0, %v3653_v0  ;;  %v3817_v3 = vld [vmem:[%s4560_s4] sm:$0xff]   ;;  %vm347_vm1 = vcmask 130048   ;;  %v3387_v4 = vld [vmem:[#allocation2 + $0x70] ss:$8 sps:$4 sm:$0xff]   ;;  %v3389_v5 = vld [vmem:[#allocation2 + $0x74] ss:$8 sps:$4 sm:$0xff]  }
  0x42   : > { %s317_s13 = scalar_select %p316_p13, %s3721_s28, 1  ;;  %477 = vmatprep.mubr.bf16.mxu1 %v3655_v1  ;;  %3382 = vset.pattern.permute.xlu1 %v3655_v1  ;;  %v3392_v6 = vld [vmem:[#allocation2 + $0x64] ss:$8 sps:$4 sm:$0xff]   ;;  %v3390_v7 = vld [vmem:[#allocation2 + $0x60] ss:$8 sps:$4 sm:$0xff]   ;;  %vm441_vm2 = vcmask 523264  }
  0x43   : > { %3380 = vset.pattern.permute.xlu0 %v3655_v1  ;;  %v3395_v8 = vld [vmem:[#allocation2 + $0x54] ss:$8 sps:$4 sm:$0xff]   ;;  %v3393_v9 = vld [vmem:[#allocation2 + $0x50] ss:$8 sps:$4 sm:$0xff]   ;;  %v3398_v10 = vld [vmem:[#allocation2 + $0x44] ss:$8 sps:$4 sm:$0xff]  }
  0x44   : > { %s2652_s16 = sshll.u32 %s317_s13, 3  ;;  %v3400_v11 = vld [vmem:[#allocation2 + $0x34] ss:$8 sps:$4 sm:$0xff]   ;;  %v3402_v12 = vld [vmem:[#allocation2 + $0x30] ss:$8 sps:$4 sm:$0xff]   ;;  %v3829_v17 = vld [vmem:[%s4560_s4 + $0x8] sm:$0xff]  }
  0x45   : > { %s320_s29 = scalar_lea.vmem %s4556_s0, %s2652_s16  ;;  %v3403_v13 = vld [vmem:[#allocation2 + $0x24] ss:$8 sps:$4 sm:$0xff]   ;;  %v3405_v14 = vld [vmem:[#allocation2 + $0x20] ss:$8 sps:$4 sm:$0xff]   ;;  %453 = vmatprep.subr.bf16.mxu1 %v3400_v11  ;;  %v3406_v15 = vld [vmem:[#allocation2 + $0x14] ss:$8 sps:$4 sm:$0xff]  }
  0x46   : > { %v3385_v2 = vld [vmem:[%s320_s29] sm:$0xff]   ;;  %454 = vmatpush1.bf16.msra.mxu1 %v3402_v12  ;;  %v3408_v18 = vld [vmem:[#allocation2 + $0x10] ss:$8 sps:$4 sm:$0xff]   ;;  %v3414_v22 = vld [vmem:[#allocation2 + $0xb4] ss:$8 sps:$4 sm:$0xff]   ;;  %vm894_vm3 = vcmask 15360  }
  0x47   : > { %2865 = vmatpush3.bf16.msra.mxu0 %v3385_v2  ;;  %v3396_v16 = vld [vmem:[#allocation2 + $0x40] ss:$8 sps:$4 sm:$0xff]   ;;  %455 = vmatprep.subr.bf16.mxu1 %v3403_v13  ;;  %v3409_v19 = vld [vmem:[#allocation2 + $0x4] ss:$8 sps:$4 sm:$0xff]   ;;  %v3412_v21 = vld [vmem:[#allocation2 + $0xb0] ss:$8 sps:$4 sm:$0xff]  }
  0x48   : > { %539 = vmatprep.subr.bf16.mxu0 %v3389_v5  ;;  %v3411_v20 = vld [vmem:[#allocation2] ss:$8 sps:$4 sm:$0xff]   ;;  %v3417_v23 = vld [vmem:[#allocation2 + $0xa4] ss:$8 sps:$4 sm:$0xff]   ;;  %v3420_v25 = vld [vmem:[#allocation2 + $0x94] ss:$8 sps:$4 sm:$0xff]  }
  0x49   : > { %v3415_v24 = vld [vmem:[#allocation2 + $0xa0] ss:$8 sps:$4 sm:$0xff]   ;;  %v3418_v26 = vld [vmem:[#allocation2 + $0x90] ss:$8 sps:$4 sm:$0xff]   ;;  %v3423_v27 = vld [vmem:[#allocation2 + $0x84] ss:$8 sps:$4 sm:$0xff]  }
  0x4a   : > { %2867 = vmatmul.mubr.msk.bf16.vlgmr.msra.gmra.mxu0 %vm347_vm1, %v3817_v3  ;;  %456 = vmatpush1.bf16.msra.mxu1 %v3405_v14  ;;  %v3421_v28 = vld [vmem:[#allocation2 + $0x80] ss:$8 sps:$4 sm:$0xff]   ;;  %v3837_v29 = vld [vmem:[%s4561_s5 + $0x78] sm:$0xff]  ;;  %v3856_v44 = vld [vmem:[%s4561_s5 + $0x70] sm:$0xff]  ;;  %s313_s15 = sand.u32 1, %s3636_s25   ;;  %s2653_s23 = sshll.u32 %s3721_s28, 8 }
  0x4b   : > { %540 = vmatpush1.bf16.msra.mxu0 %v3387_v4  ;;  %563 = vmatprep.mubr.bf16.mxu0 %v3655_v1  ;;  %v3864_v45 = vld [vmem:[%s4561_s5 + $0x68] sm:$0xff]  ;;  %v3873_v46 = vld [vmem:[%s4561_s5 + $0x60] sm:$0xff]  ;;  %v3882_v47 = vld [vmem:[%s4561_s5 + $0x58] sm:$0xff]  ;;  %s2558_s19 = sshll.u32 %s313_s15, 4  ;;  %s4510_s29 = scalar_lea.hbm %s4563_s7, %s2653_s23 }
  0x4c   : > { %541 = vmatprep.subr.bf16.mxu0 %v3392_v6  ;;  %457 = vmatprep.subr.bf16.mxu1 %v3406_v15  ;;  %v3891_v48 = vld [vmem:[%s4561_s5 + $0x50] sm:$0xff]  ;;  %v3897_v49 = vld [vmem:[%s4561_s5 + $0x48] sm:$0xff]  ;;  %v3906_v50 = vld [vmem:[%s4561_s5 + $0x40] sm:$0xff]  ;;  %s315_s13 = scalar_lea.vmem [#allocation8], %s2558_s19  ;;  %s4516_s28 = scalar_lea.sflag [#allocation4], %s313_s15 }
  0x4d   : > { %v3915_v51 = vld [vmem:[%s4561_s5 + $0x38] sm:$0xff]  ;;  %v3924_v52 = vld [vmem:[%s4561_s5 + $0x30] sm:$0xff]  ;;  %v3933_v53 = vld [vmem:[%s4561_s5 + $0x28] sm:$0xff]  ;;  %s2455_s16 = sshll.u32 %s315_s13, 4  ;;  %s3657_s9 = smov [#allocation8]   ;;  %s4512_s16 = int_to_ptr.vmem [resolvable:$true] %s2455_s16 }
  0x4e   : > { %458 = vmatpush1.bf16.msra.mxu1 %v3408_v18  ;;  %v3942_v54 = vld [vmem:[%s4561_s5 + $0x20] sm:$0xff]  ;;  %v3951_v55 = vld [vmem:[%s4561_s5 + $0x18] sm:$0xff]  ;;  %v3963_v56 = vld [vmem:[%s4561_s5 + $0x10] sm:$0xff]  ;;  %s3576_s8 = scalar_lea.vmem %s4512_s16, 256  ;;  %s3580_s14 = sshll.u32 %s3657_s9, 4  ;;  %s3581_s14 = int_to_ptr.vmem [resolvable:$false] %s3580_s14 }
  0x4f   : > { %542 = vmatpush1.bf16.msra.mxu0 %v3390_v7  ;;  %459 = vmatprep.subr.bf16.mxu1 %v3409_v19  ;;  %v3972_v57 = vld [vmem:[%s4561_s5 + $0x8] sm:$0xff]  ;;  %v3981_v58 = vld [vmem:[%s4561_s5] sm:$0xff]  ;;  %p3577_p9 = scmp.ne.s32.totalorder %s4512_s16, %s3576_s8  ;;  %s3582_s17 = scalar_lea.vmem %s3581_s14, 512 }
  0x50   : > { %543 = vmatprep.subr.bf16.mxu0 %v3395_v8  ;;  %p3583_p7 = scmp.lt.s32.totalorder %s4512_s16, %s3581_s14  ;;  %p3584_p8 = scmp.lt.s32.totalorder %s3582_s17, %s3576_s8 }
  0x51   : > { %p3578_p10 = pnand %p3577_p9, %p3738_p5 }
  0x52   : > { %460 = vmatpush1.bf16.msra.mxu1 %v3411_v20  ;;  %p3585_p11 = por %p3584_p8, %p3583_p7 }
  0x53   : > { %544 = vmatpush1.bf16.msra.mxu0 %v3393_v9  ;;  %2876 = vmatprep.subr.mxu1 %v3837_v29  ;;  %p3579_p12 = pneg %p3578_p10 }
  0x54   : > { %545 = vmatprep.subr.bf16.mxu0 %v3398_v10 }
  0x55   : > { %p3586_p0 = pnand %p3585_p11, %p3579_p12 }
  0x57   : > { %546 = vmatpush1.bf16.msra.mxu0 %v3396_v16 }
  0x58   : > { %2870 = vmatprep.subr.bf16.mxu0 %v3653_v0 }
  0x5a   : > { %2581 = vmatmul.mubr.msk.bf16.vlgmr.msra.gmra.mxu0 %vm441_vm2, %v3385_v2 }
  0x5b   : > { %2871 = vmatpush3.bf16.msra.mxu0 %v3385_v2  ;;  %2872 = vmatprep.mubr.msk.bf16.mxu0 %vm3654_vm0, %v3653_v0 }
  0x5c   : > { %687 = vmatprep.subr.bf16.mxu0 %v3414_v22 }
  0x62   : > { %2873 = vmatmul.mubr.msk.bf16.vlgmr.msra.gmra.mxu0 %vm347_vm1, %v3829_v17 }
  0x63   : > { %711 = vmatprep.mubr.bf16.mxu0 %v3655_v1  ;;  %688 = vmatpush1.bf16.msra.mxu0 %v3412_v21 }
  0x64   : > { %689 = vmatprep.subr.bf16.mxu0 %v3417_v23 }
  0x67   : > { %690 = vmatpush1.bf16.msra.mxu0 %v3415_v24 }
  0x68   : > { %691 = vmatprep.subr.bf16.mxu0 %v3420_v25 }
  0x6b   : > { %692 = vmatpush1.bf16.msra.mxu0 %v3418_v26 }
  0x6c   : > { %693 = vmatprep.subr.bf16.mxu0 %v3423_v27 }
  0x6f   : > { %694 = vmatpush1.bf16.msra.mxu0 %v3421_v28 }
  0x70   : > { %2911 = vmatprep.subr.mxu0 %v3837_v29 }
 0x10a   : > { %v385_v30 = vpop.f32.mrf.mxu0 }
 0x10c   : > { %v2868_v31 = vpop.f32.mrf.mxu0 }
 0x10e   : > { %v388_v32 = vpop.f32.mrf.mxu0 }
 0x10f   : > { %v392_v33 = vpack.c.bf16 %v388_v32, %v385_v30 }
 0x110   : > { %v2869_v34 = vpop.f32.mrf.mxu0 }
 0x111   : > { %2572 = vmatmul.mubr.msk.bf16.vlgmr.msra.gmra.mxu1 %vm441_vm2, %v392_v33 }
 0x112   : > { %2877 = vmatpush3.msra.mxu1 %v3837_v29 }
 0x113   : > { %2878 = vmatprep.subr.mxu1 %v3856_v44 }
 0x114   : > { %2879 = vmatpush3.msra.mxu1 %v3856_v44 }
 0x115   : > { %2880 = vmatprep.subr.mxu1 %v3864_v45 }
 0x116   : > { %2881 = vmatpush3.msra.mxu1 %v3864_v45 }
 0x117   : > { %2882 = vmatprep.subr.mxu1 %v3873_v46 }
 0x118   : > { %2883 = vmatpush3.msra.mxu1 %v3873_v46 }
 0x119   : > { %2884 = vmatprep.subr.mxu1 %v3882_v47 }
 0x11a   : > { %v3843_v35 = vpop.f32.mrf.mxu0  ;;  %2885 = vmatpush3.msra.mxu1 %v3882_v47 }
 0x11b   : > { %2886 = vmatprep.subr.mxu1 %v3891_v48 }
 0x11c   : > { %v3845_v36 = vpop.f32.mrf.mxu0  ;;  %2887 = vmatpush3.msra.mxu1 %v3891_v48 }
 0x11d   : > { %2888 = vmatprep.subr.mxu1 %v3897_v49 }
 0x11e   : > { %v3847_v37 = vpop.f32.mrf.mxu0  ;;  %2889 = vmatpush3.msra.mxu1 %v3897_v49 }
 0x11f   : > { %2890 = vmatprep.subr.mxu1 %v3906_v50 }
 0x120   : > { %v3849_v38 = vpop.f32.mrf.mxu0  ;;  %2891 = vmatpush3.msra.mxu1 %v3906_v50 }
 0x121   : > { %2892 = vmatprep.subr.mxu1 %v3915_v51 }
 0x122   : > { %v619_v39 = vpop.f32.mrf.mxu0  ;;  %2893 = vmatpush3.msra.mxu1 %v3915_v51 }
 0x123   : > { %2894 = vmatprep.subr.mxu1 %v3924_v52 }
 0x124   : > { %v2874_v40 = vpop.f32.mrf.mxu0  ;;  %2895 = vmatpush3.msra.mxu1 %v3924_v52 }
 0x125   : > { %2896 = vmatprep.subr.mxu1 %v3933_v53 }
 0x126   : > { %v622_v41 = vpop.f32.mrf.mxu0  ;;  %2897 = vmatpush3.msra.mxu1 %v3933_v53 }
 0x127   : > { %v626_v42 = vpack.c.bf16 %v622_v41, %v619_v39  ;;  %2898 = vmatprep.subr.mxu1 %v3942_v54 }
 0x128   : > { %v2875_v43 = vpop.f32.mrf.mxu0  ;;  %2899 = vmatpush3.msra.mxu1 %v3942_v54 }
 0x129   : > { %2594 = vmatmul.mubr.msk.bf16.vlgmr.msra.gmra.mxu0 %vm441_vm2, %v626_v42  ;;  %2900 = vmatprep.subr.mxu1 %v3951_v55 }
 0x12a   : > { %2912 = vmatpush3.msra.mxu0 %v3837_v29  ;;  %2901 = vmatpush3.msra.mxu1 %v3951_v55 }
 0x12b   : > { %2913 = vmatprep.subr.mxu0 %v3856_v44  ;;  %2902 = vmatprep.subr.mxu1 %v3963_v56 }
 0x12c   : > { %2914 = vmatpush3.msra.mxu0 %v3856_v44  ;;  %2903 = vmatpush3.msra.mxu1 %v3963_v56 }
 0x12d   : > { %2915 = vmatprep.subr.mxu0 %v3864_v45  ;;  %2904 = vmatprep.subr.mxu1 %v3972_v57 }
 0x12e   : > { %2916 = vmatpush3.msra.mxu0 %v3864_v45  ;;  %2905 = vmatpush3.msra.mxu1 %v3972_v57 }
 0x12f   : > { %2917 = vmatprep.subr.mxu0 %v3873_v46  ;;  %2906 = vmatprep.subr.mxu1 %v3981_v58 }
 0x130   : > { %2918 = vmatpush3.msra.mxu0 %v3873_v46  ;;  %2907 = vmatpush3.msra.mxu1 %v3981_v58 }
 0x131   : > { %2919 = vmatprep.subr.mxu0 %v3882_v47  ;;  %2946 = vmatprep.subr.mxu1 %v3837_v29 }
 0x132   : > { %2920 = vmatpush3.msra.mxu0 %v3882_v47 }
 0x133   : > { %2921 = vmatprep.subr.mxu0 %v3891_v48 }
 0x134   : > { %2922 = vmatpush3.msra.mxu0 %v3891_v48 }
 0x135   : > { %2923 = vmatprep.subr.mxu0 %v3897_v49 }
 0x136   : > { %2924 = vmatpush3.msra.mxu0 %v3897_v49 }
 0x137   : > { %2925 = vmatprep.subr.mxu0 %v3906_v50 }
 0x138   : > { %2926 = vmatpush3.msra.mxu0 %v3906_v50 }
 0x139   : > { %2927 = vmatprep.subr.mxu0 %v3915_v51 }
 0x13a   : > { %2928 = vmatpush3.msra.mxu0 %v3915_v51 }
 0x13b   : > { %2929 = vmatprep.subr.mxu0 %v3924_v52 }
 0x13c   : > { %2930 = vmatpush3.msra.mxu0 %v3924_v52 }
 0x13d   : > { %2931 = vmatprep.subr.mxu0 %v3933_v53 }
 0x13e   : > { %2932 = vmatpush3.msra.mxu0 %v3933_v53 }
 0x13f   : > { %2933 = vmatprep.subr.mxu0 %v3942_v54 }
 0x140   : > { %2934 = vmatpush3.msra.mxu0 %v3942_v54 }
 0x141   : > { %2935 = vmatprep.subr.mxu0 %v3951_v55 }
 0x142   : > { %2936 = vmatpush3.msra.mxu0 %v3951_v55 }
 0x143   : > { %2937 = vmatprep.subr.mxu0 %v3963_v56 }
 0x144   : > { %2938 = vmatpush3.msra.mxu0 %v3963_v56 }
 0x145   : > { %2939 = vmatprep.subr.mxu0 %v3972_v57 }
 0x146   : > { %2940 = vmatpush3.msra.mxu0 %v3972_v57 }
 0x147   : > { %2941 = vmatprep.subr.mxu0 %v3981_v58 }
 0x148   : > { %2942 = vmatpush3.msra.mxu0 %v3981_v58 }
 0x149   : > { %2981 = vmatprep.subr.mxu0 %v3837_v29 }
 0x1d1   : > { %v479_v59 = vpop.f32.mrf.mxu1 }
 0x1d2   : > { %v566_v61 = vadd.f32 %v3843_v35, %v479_v59 }
 0x1d3   : > { %v481_v60 = vpop.f32.mrf.mxu1 }
 0x1d4   : > { %v568_v7 = vadd.f32 %v3845_v36, %v481_v60 }
 0x1d5   : > { %v483_v62 = vpop.f32.mrf.mxu1 }
 0x1d6   : > { %v570_v5 = vadd.f32 %v3847_v37, %v483_v62 }
 0x1d7   : > { %v485_v13 = vpop.f32.mrf.mxu1 }
 0x1d8   : > { %v572_v15 = vadd.f32 %v3849_v38, %v485_v13 }
 0x1e9   : > { %v713_v63 = vpop.f32.mrf.mxu0 }
 0x1ea   : > { %v3991_v2 = vadd.f32 %v713_v63, %v566_v61  ;;  %v3424_v61 = vld [vmem:[#allocation5 + $0x78] sm:$0xff]   ;;  %v3656_v63 = vmov 1  }
 0x1eb   : > { %v715_v4 = vpop.f32.mrf.mxu0 }
 0x1ec   : > { %2908 = vmatprep.mubr.f32.mxu1 %v3991_v2  ;;  %v817_v6 = vmul.f32 %v3991_v2, %v3991_v2  ;;  %v4000_v10 = vadd.f32 %v715_v4, %v568_v7  ;;  %v3425_v4 = vld [vmem:[#allocation5 + $0x70] sm:$0xff]  }
 0x1ed   : > { %v717_v8 = vpop.f32.mrf.mxu0 }
 0x1ee   : > { %v3998_v9 = vadd.f32 %v717_v8, %v570_v5  ;;  %2943 = vmatprep.mubr.f32.mxu0 %v817_v6  ;;  %v1044_v12 = vmul.f32 %v4000_v10, %v4000_v10 }
 0x1ef   : > { %v719_v14 = vpop.f32.mrf.mxu0 }
 0x1f0   : > { %v818_v11 = vmul.f32 %v3998_v9, %v3998_v9  ;;  %2909 = vmatmul.mubr.f32.vlgmr.msra.gmra.mxu1 %v3998_v9  ;;  %v4062_v16 = vadd.f32 %v719_v14, %v572_v15 }
 0x1f1   : > { %2947 = vmatpush3.msra.mxu1 %v3837_v29  ;;  %2978 = vmatprep.mubr.f32.mxu1 %v4000_v10 }
 0x1f2   : > { %2948 = vmatprep.subr.mxu1 %v3856_v44  ;;  %2944 = vmatmul.mubr.f32.vlgmr.msra.gmra.mxu0 %v818_v11  ;;  %v1045_v18 = vmul.f32 %v4062_v16, %v4062_v16 }
 0x1f3   : > { %2949 = vmatpush3.msra.mxu1 %v3856_v44  ;;  %2982 = vmatpush3.msra.mxu0 %v3837_v29 }
 0x1f4   : > { %2950 = vmatprep.subr.mxu1 %v3864_v45  ;;  %2983 = vmatprep.subr.mxu0 %v3856_v44 }
 0x1f5   : > { %3013 = vmatprep.mubr.f32.mxu0 %v1044_v12  ;;  %2951 = vmatpush3.msra.mxu1 %v3864_v45 }
 0x1f6   : > { %2984 = vmatpush3.msra.mxu0 %v3856_v44  ;;  %2952 = vmatprep.subr.mxu1 %v3873_v46 }
 0x1f7   : > { %2985 = vmatprep.subr.mxu0 %v3864_v45  ;;  %2953 = vmatpush3.msra.mxu1 %v3873_v46 }
 0x1f8   : > { %2986 = vmatpush3.msra.mxu0 %v3864_v45  ;;  %2954 = vmatprep.subr.mxu1 %v3882_v47 }
 0x1f9   : > { %2987 = vmatprep.subr.mxu0 %v3873_v46  ;;  %2955 = vmatpush3.msra.mxu1 %v3882_v47 }
 0x1fa   : > { %2988 = vmatpush3.msra.mxu0 %v3873_v46  ;;  %2956 = vmatprep.subr.mxu1 %v3891_v48 }
 0x1fb   : > { %2989 = vmatprep.subr.mxu0 %v3882_v47  ;;  %2957 = vmatpush3.msra.mxu1 %v3891_v48 }
 0x1fc   : > { %2990 = vmatpush3.msra.mxu0 %v3882_v47  ;;  %2958 = vmatprep.subr.mxu1 %v3897_v49 }
 0x1fd   : > { %2991 = vmatprep.subr.mxu0 %v3891_v48  ;;  %2959 = vmatpush3.msra.mxu1 %v3897_v49 }
 0x1fe   : > { %2992 = vmatpush3.msra.mxu0 %v3891_v48  ;;  %2960 = vmatprep.subr.mxu1 %v3906_v50 }
 0x1ff   : > { %2993 = vmatprep.subr.mxu0 %v3897_v49  ;;  %2961 = vmatpush3.msra.mxu1 %v3906_v50 }
 0x200   : > { %2994 = vmatpush3.msra.mxu0 %v3897_v49  ;;  %2962 = vmatprep.subr.mxu1 %v3915_v51 }
 0x201   : > { %2995 = vmatprep.subr.mxu0 %v3906_v50  ;;  %2963 = vmatpush3.msra.mxu1 %v3915_v51 }
 0x202   : > { %2996 = vmatpush3.msra.mxu0 %v3906_v50  ;;  %2964 = vmatprep.subr.mxu1 %v3924_v52 }
 0x203   : > { %2997 = vmatprep.subr.mxu0 %v3915_v51  ;;  %2965 = vmatpush3.msra.mxu1 %v3924_v52 }
 0x204   : > { %2998 = vmatpush3.msra.mxu0 %v3915_v51  ;;  %2966 = vmatprep.subr.mxu1 %v3933_v53 }
 0x205   : > { %2999 = vmatprep.subr.mxu0 %v3924_v52  ;;  %2967 = vmatpush3.msra.mxu1 %v3933_v53 }
 0x206   : > { %3000 = vmatpush3.msra.mxu0 %v3924_v52  ;;  %2968 = vmatprep.subr.mxu1 %v3942_v54 }
 0x207   : > { %3001 = vmatprep.subr.mxu0 %v3933_v53  ;;  %2969 = vmatpush3.msra.mxu1 %v3942_v54 }
 0x208   : > { %3002 = vmatpush3.msra.mxu0 %v3933_v53  ;;  %2970 = vmatprep.subr.mxu1 %v3951_v55 }
 0x209   : > { %3003 = vmatprep.subr.mxu0 %v3942_v54  ;;  %2971 = vmatpush3.msra.mxu1 %v3951_v55 }
 0x20a   : > { %3004 = vmatpush3.msra.mxu0 %v3942_v54  ;;  %2972 = vmatprep.subr.mxu1 %v3963_v56 }
 0x20b   : > { %3005 = vmatprep.subr.mxu0 %v3951_v55  ;;  %2973 = vmatpush3.msra.mxu1 %v3963_v56 }
 0x20c   : > { %3006 = vmatpush3.msra.mxu0 %v3951_v55  ;;  %2974 = vmatprep.subr.mxu1 %v3972_v57 }
 0x20d   : > { %3007 = vmatprep.subr.mxu0 %v3963_v56  ;;  %2975 = vmatpush3.msra.mxu1 %v3972_v57 }
 0x20e   : > { %3008 = vmatpush3.msra.mxu0 %v3963_v56  ;;  %2976 = vmatprep.subr.mxu1 %v3981_v58 }
 0x20f   : > { %3009 = vmatprep.subr.mxu0 %v3972_v57  ;;  %2977 = vmatpush3.msra.mxu1 %v3981_v58 }
 0x210   : > { %3010 = vmatpush3.msra.mxu0 %v3972_v57  ;;  %2979 = vmatmul.mubr.f32.vlgmr.msra.gmra.mxu1 %v4062_v16 }
 0x211   : > { %3011 = vmatprep.subr.mxu0 %v3981_v58  ;;  %3016 = vmatprep.subr.bf16.mxu1 %v3653_v0 }
 0x212   : > { %3012 = vmatpush3.msra.mxu0 %v3981_v58  ;;  %3018 = vmatprep.mubr.msk.bf16.mxu1 %vm3654_vm0, %v3653_v0 }
 0x213   : > { %3014 = vmatmul.mubr.f32.vlgmr.msra.gmra.mxu0 %v1045_v18  ;;  %3042 = vmatprep.subr.bf16.mxu0 %v3653_v0 }
 0x214   : > { %3058 = vmatprep.mubr.msk.bf16.mxu0 %vm3654_vm0, %v3653_v0  ;;  %3043 = vmatpush3.bf16.msra.mxu0 %v3424_v61  ;;  %v4112_v61 = vld [vmem:[%s4562_s6 + $0x8] sm:$0x1] }
 0x215   : > { %3044 = vmatprep.subr.bf16.mxu0 %v3653_v0 }
 0x218   : > { %3045 = vmatpush3.bf16.msra.mxu0 %v3425_v4 }
 0x219   : > { %3046 = vmatprep.subr.bf16.mxu0 %v3653_v0 }
 0x2b0   : > { %v2910_v19 = vpop.f32.mrf.mxu1 }
 0x2b1   : > { %v896_v22 = vsel %vm894_vm3, %v2910_v19, 0.0 }
 0x2b2   : > { %v808_v20 = vpop.f32.mrf.mxu1  ;;  %v2945_v21 = vpop.f32.mrf.mxu0 }
 0x2b3   : > { %v895_v23 = vsel %vm894_vm3, %v808_v20, 0.0  ;;  %v905_v26 = vsel %vm894_vm3, %v2945_v21, 0.0  ;;  %v3426_v20 = vld [vmem:[#allocation5 + $0x68] sm:$0xff]  }
 0x2b4   : > { %v897_v24 = vadd.f32 %v896_v22, %v895_v23  ;;  %v885_v25 = vpop.f32.mrf.mxu0  ;;  %3047 = vmatpush3.bf16.msra.mxu0 %v3426_v20 }
 0x2b5   : > { %v904_v27 = vsel %vm894_vm3, %v885_v25, 0.0  ;;  %3048 = vmatprep.subr.bf16.mxu0 %v3653_v0 }
 0x2b6   : > { %v898_v28 = vrot.slane %v897_v24, 4  ;;  %v906_v30 = vadd.f32 %v905_v26, %v904_v27  ;;  %v3427_v26 = vld [vmem:[#allocation5 + $0x60] sm:$0xff]  }
 0x2b8   : > { %v899_v31 = vadd.f32 %v898_v28, %v897_v24  ;;  %v907_v32 = vrot.slane %v906_v30, 4  ;;  %3049 = vmatpush3.bf16.msra.mxu0 %v3427_v26 }
 0x2b9   : > { %3050 = vmatprep.subr.bf16.mxu0 %v3653_v0 }
 0x2ba   : > { %v900_v33 = vrot.slane %v899_v31, 2  ;;  %v908_v34 = vadd.f32 %v907_v32, %v906_v30  ;;  %v3428_v32 = vld [vmem:[#allocation5 + $0x58] sm:$0xff]  }
 0x2bc   : > { %v901_v35 = vadd.f32 %v900_v33, %v899_v31  ;;  %v909_v36 = vrot.slane %v908_v34, 2  ;;  %3051 = vmatpush3.bf16.msra.mxu0 %v3428_v32 }
 0x2bd   : > { %3052 = vmatprep.subr.bf16.mxu0 %v3653_v0 }
 0x2be   : > { %v910_v37 = vadd.f32 %v909_v36, %v908_v34  ;;  %v902_v38 = vrot.slane %v901_v35, 1 }
 0x2c0   : > { %v911_v39 = vrot.slane %v910_v37, 1  ;;  %v903_v40 = vadd.f32 %v902_v38, %v901_v35 }
 0x2c2   : > { %v912_v41 = vadd.f32 %v911_v39, %v910_v37  ;;  %v914_v42 = vmul.f32 0.0009765625, %v903_v40  ;;  %v3429_v37 = vld [vmem:[#allocation5 + $0x50] sm:$0xff]  }
 0x2c3   : > { %3053 = vmatpush3.bf16.msra.mxu0 %v3429_v37  ;;  %v3438_v37 = vld [vmem:[#allocation5 + $0x8] sm:$0xff]  }
 0x2c4   : > { %v915_v43 = vmul.f32 0.0009765625, %v912_v41  ;;  %939 = vperm.xlu1 %3382, %v914_v42   ;;  %v916_v59 = vmul.f32 %v914_v42, %v914_v42  ;;  %3054 = vmatprep.subr.bf16.mxu0 %v3653_v0  ;;  %v3430_v41 = vld [vmem:[#allocation5 + $0x48] sm:$0xff]  }
 0x2c6   : > { %v917_v60 = vsub.f32 %v915_v43, %v916_v59 }
 0x2c7   : > { %3055 = vmatpush3.bf16.msra.mxu0 %v3430_v41  ;;  %v3439_v41 = vld [vmem:[#allocation5] sm:$0xff]  }
 0x2c8   : > { %v918_v62 = vmax.f32 %v917_v60, 0.0  ;;  %3383 = vset.pattern.permute.xlu1 %v3656_v63  ;;  %3056 = vmatprep.subr.bf16.mxu0 %v3653_v0  ;;  %v951_v60 = vlaneseq }
 0x2c9   : > { %944 = vperm.xlu1 %3383, %v914_v42   ;;  %v3431_v42 = vld [vmem:[#allocation5 + $0x40] sm:$0xff]  }
 0x2ca   : > { %v919_v5 = vadd.f32 1e-05, %v918_v62  ;;  %v4115_v62 = vsub.f32 1.0, %v4112_v61  ;;  %v952_v4 = vshrl.u32 %v951_v60, 7  ;;  %v3443_v60 = vld [vmem:[#allocation5 + $0xa0] sm:$0xff]  }
 0x2cb   : > { %3057 = vmatpush3.bf16.msra.mxu0 %v3431_v42  ;;  %v3440_v42 = vld [vmem:[#allocation5 + $0xb8] sm:$0xff]  }
 0x2cc   : > { %3472 = vrsqrt.f32 %v919_v5  ;;  %3068 = vmatprep.subr.bf16.mxu0 %v3653_v0 }
 0x2cd   : > { %3384 = vset.pattern.permute.xlu1 %v3655_v1 }
 0x2d0   : > { %v2980_v6 = vpop.f32.mrf.mxu1 }
 0x2d1   : > { %v1122_v8 = vsel %vm894_vm3, %v2980_v6, 0.0 }
 0x2d2   : > { %v1035_v7 = vpop.f32.mrf.mxu1 }
 0x2d3   : > { %v1121_v11 = vsel %vm894_vm3, %v1035_v7, 0.0  ;;  %v3015_v12 = vpop.f32.mrf.mxu0 }
 0x2d4   : > { %v1123_v13 = vadd.f32 %v1122_v8, %v1121_v11  ;;  %v1131_v18 = vsel %vm894_vm3, %v3015_v12, 0.0  ;;  %v934_v11 = vld [vmem:[%s4562_s6] sm:$0x1] }
 0x2d5   : > { %v1112_v14 = vpop.f32.mrf.mxu0 }
 0x2d6   : > { %v1124_v15 = vrot.slane %v1123_v13, 4  ;;  %v1130_v19 = vsel %vm894_vm3, %v1112_v14, 0.0 }
 0x2d7   : > { %v1132_v21 = vadd.f32 %v1131_v18, %v1130_v19  ;;  %v936_v19 = vld [vmem:[%s4562_s6 + $0x1] sm:$0x1] }
 0x2d8   : > { %v1125_v22 = vadd.f32 %v1124_v15, %v1123_v13  ;;  %v4124_v13 = vsub.s32 0, %v952_v4 }
 0x2d9   : > { %v3473_v1 = vpop.eup %3472  ;;  %v1133_v23 = vrot.slane %v1132_v21, 4 }
 0x2da   : > { %v1126_v24 = vrot.slane %v1125_v22, 2  ;;  %923 = vperm.xlu0 %3380, %v3473_v1  }
 0x2db   : > { %v1134_v25 = vadd.f32 %v1133_v23, %v1132_v21 }
 0x2dc   : > { %v1127_v27 = vadd.f32 %v1126_v24, %v1125_v22 }
 0x2dd   : > { %v1135_v28 = vrot.slane %v1134_v25, 2 }
 0x2de   : > { %v1128_v30 = vrot.slane %v1127_v27, 1  ;;  %3381 = vset.pattern.permute.xlu0 %v3656_v63 }
 0x2df   : > { %v1136_v31 = vadd.f32 %v1135_v28, %v1134_v25  ;;  %929 = vperm.xlu0 %3381, %v3473_v1  }
 0x2e0   : > { %v1129_v33 = vadd.f32 %v1128_v30, %v1127_v27 }
 0x2e1   : > { %v1137_v34 = vrot.slane %v1136_v31, 1 }
 0x2e2   : > { %v4095_v35 = vmul.f32 0.0009765625, %v1129_v33  ;;  %v3432_v33 = vld [vmem:[#allocation5 + $0x38] sm:$0xff]  }
 0x2e3   : > { %v1138_v36 = vadd.f32 %v1137_v34, %v1136_v31  ;;  %v3435_v34 = vld [vmem:[#allocation5 + $0x20] sm:$0xff]  }
 0x2e4   : > { %v4100_v38 = vmul.f32 %v4095_v35, %v4095_v35 }
 0x2e5   : > { %v4102_v39 = vmul.f32 0.0009765625, %v1138_v36  ;;  %v3436_v36 = vld [vmem:[#allocation5 + $0x18] sm:$0xff]  }
 0x2e7   : > { %v1142_v40 = vsub.f32 %v4102_v39, %v4100_v38  ;;  %v3454_v38 = vld [vmem:[#allocation7 + $0x48] sm:$0xff]   ;;  %v3455_v39 = vld [vmem:[#allocation7 + $0x40] sm:$0xff]  }
 0x33f   : > { %v940_v43 = vpop.permute.xlu1 %939 }
 0x340   : > { %v942_v12 = vmul.f32 %v940_v43, %v4112_v61  ;;  %v3441_v43 = vld [vmem:[#allocation5 + $0xb0] sm:$0xff]  }
 0x344   : > { %v945_v63 = vpop.permute.xlu1 %944 }
 0x345   : > { %v947_v6 = vmul.f32 %v945_v63, %v4115_v62 }
 0x347   : > { %v948_v15 = vadd.f32 %v947_v6, %v942_v12 }
 0x355   : > { %v924_v59 = vpop.permute.xlu0 %923 }
 0x356   : > { %v926_v7 = vmul.f32 %v924_v59, %v4112_v61  ;;  %v3442_v59 = vld [vmem:[#allocation5 + $0xa8] sm:$0xff]  }
 0x35a   : > { %v930_v5 = vpop.permute.xlu0 %929 }
 0x35b   : > { %v932_v8 = vmul.f32 %v930_v5, %v4115_v62 }
 0x35d   : > { %v933_v14 = vadd.f32 %v932_v8, %v926_v7 }
 0x35f   : > { %v935_v18 = vmul.f32 %v934_v11, %v933_v14 }
 0x361   : > { %v949_v20 = vmul.f32 %v948_v15, %v935_v18  ;;  %v954_v21 = vrot.slane %v935_v18, %v4124_v13  ;;  %v3445_v15 = vld [vmem:[#allocation5 + $0x90] sm:$0xff]   ;;  %v3446_v18 = vld [vmem:[#allocation5 + $0x88] sm:$0xff]  }
 0x363   : > { %v950_v22 = vsub.f32 %v936_v19, %v949_v20  ;;  %v955_v1 = vmul.f32 %v954_v21, %v3991_v2  ;;  %v956_v23 = vmul.f32 %v954_v21, %v3998_v9  ;;  %v3433_v2 = vld [vmem:[#allocation5 + $0x30] sm:$0xff]   ;;  %v3434_v9 = vld [vmem:[#allocation5 + $0x28] sm:$0xff]   ;;  %v3447_v19 = vld [vmem:[#allocation5 + $0x80] sm:$0xff]  }
 0x365   : > { %v960_v24 = vrot.slane %v950_v22, %v4124_v13 }
 0x367   : > { %v961_v25 = vadd.f32 %v960_v24, %v955_v1  ;;  %v962_v26 = vadd.f32 %v960_v24, %v956_v23 }
 0x369   : > { %vm963_vm4 = vcmp.ge.f32.partialorder %v961_v25, 0.0  ;;  %vm964_vm5 = vcmp.ge.f32.partialorder %v962_v26, 0.0  ;;  %v965_v27 = vmul.f32 0.1, %v961_v25  ;;  %v966_v28 = vmul.f32 0.1, %v962_v26 }
 0x36b   : > { %v967_v30 = vsel %vm963_vm4, %v961_v25, %v965_v27  ;;  %v968_v31 = vsel %vm964_vm5, %v962_v26, %v966_v28 }
 0x36c   : > { %v1187_v32 = vpack.c.bf16 %v968_v31, %v967_v30 }
 0x36e   : > { %3017 = vmatpush3.bf16.msra.mxu1 %v1187_v32  ;;  %3059 = vmatmul.mubr.bf16.vlgmr.msra.gmra.mxu0 %v1187_v32 }
 0x36f   : > { %3022 = vmatprep.subr.bf16.mxu1 %v3653_v0  ;;  %3084 = vmatprep.mubr.msk.bf16.mxu0 %vm3654_vm0, %v3653_v0 }
 0x370   : > { %3069 = vmatpush3.bf16.msra.mxu0 %v3440_v42 }
 0x371   : > { %3019 = vmatmul.mubr.msk.bf16.vlgmr.msra.gmra.mxu1 %vm347_vm1, %v3817_v3  ;;  %v3437_v3 = vld [vmem:[#allocation5 + $0x10] sm:$0xff]   ;;  %3070 = vmatprep.subr.bf16.mxu0 %v3653_v0 }
 0x372   : > { %3023 = vmatpush3.bf16.msra.mxu1 %v3432_v33  ;;  %3038 = vmatprep.mubr.msk.bf16.mxu1 %vm3654_vm0, %v3653_v0 }
 0x373   : > { %3024 = vmatprep.subr.bf16.mxu1 %v3653_v0 }
 0x374   : > { %3071 = vmatpush3.bf16.msra.mxu0 %v3441_v43 }
 0x375   : > { %3072 = vmatprep.subr.bf16.mxu0 %v3653_v0 }
 0x376   : > { %3025 = vmatpush3.bf16.msra.mxu1 %v3433_v2 }
 0x377   : > { %3026 = vmatprep.subr.bf16.mxu1 %v3653_v0 }
 0x378   : > { %3073 = vmatpush3.bf16.msra.mxu0 %v3442_v59 }
 0x379   : > { %3074 = vmatprep.subr.bf16.mxu0 %v3653_v0 }
 0x37a   : > { %3027 = vmatpush3.bf16.msra.mxu1 %v3434_v9 }
 0x37b   : > { %3028 = vmatprep.subr.bf16.mxu1 %v3653_v0 }
 0x37c   : > { %3075 = vmatpush3.bf16.msra.mxu0 %v3443_v60 }
 0x37d   : > { %3076 = vmatprep.subr.bf16.mxu0 %v3653_v0 }
 0x37e   : > { %3029 = vmatpush3.bf16.msra.mxu1 %v3435_v34 }
 0x37f   : > { %3030 = vmatprep.subr.bf16.mxu1 %v3653_v0 }
 0x382   : > { %3031 = vmatpush3.bf16.msra.mxu1 %v3436_v36 }
 0x383   : > { %3032 = vmatprep.subr.bf16.mxu1 %v3653_v0 }
 0x386   : > { %3033 = vmatpush3.bf16.msra.mxu1 %v3437_v3 }
 0x387   : > { %3034 = vmatprep.subr.bf16.mxu1 %v3653_v0 }
 0x38a   : > { %3035 = vmatpush3.bf16.msra.mxu1 %v3438_v37 }
 0x38b   : > { %3036 = vmatprep.subr.bf16.mxu1 %v3653_v0 }
 0x38e   : > { %3037 = vmatpush3.bf16.msra.mxu1 %v3439_v41 }
 0x38f   : > { %3062 = vmatprep.subr.bf16.mxu1 %v3653_v0 }
 0x42e   : > { %v4152_v63 = vpop.f32.mrf.mxu0 }
 0x430   : > { %v3060_v4 = vpop.f32.mrf.mxu0 }
 0x431   : > { %v1239_v5 = vpop.f32.mrf.mxu1 }
 0x432   : > { %v4154_v6 = vpop.f32.mrf.mxu0 }
 0x433   : > { %v3020_v7 = vpop.f32.mrf.mxu1 }
 0x434   : > { %v3061_v8 = vpop.f32.mrf.mxu0 }
 0x435   : > { %v1242_v11 = vpop.f32.mrf.mxu1 }
 0x436   : > { %v1246_v12 = vpack.c.bf16 %v1242_v11, %v1239_v5 }
 0x437   : > { %v3021_v14 = vpop.f32.mrf.mxu1 }
 0x438   : > { %3039 = vmatmul.mubr.bf16.vlgmr.msra.gmra.mxu1 %v1246_v12 }
 0x439   : > { %3063 = vmatpush3.bf16.msra.mxu1 %v1187_v32  ;;  %3064 = vmatprep.mubr.msk.bf16.mxu1 %vm3654_vm0, %v3653_v0 }
 0x43a   : > { %3088 = vmatprep.subr.mxu1 %v3837_v29 }
 0x440   : > { %3065 = vmatmul.mubr.msk.bf16.vlgmr.msra.gmra.mxu1 %vm347_vm1, %v3829_v17  ;;  %v3444_v17 = vld [vmem:[#allocation5 + $0x98] sm:$0xff]  }
 0x441   : > { %3089 = vmatpush3.msra.mxu1 %v3837_v29  ;;  %3077 = vmatpush3.bf16.msra.mxu0 %v3444_v17  ;;  %v1143_v17 = vmax.f32 %v1142_v40, 0.0  ;;  %v4264_v40 = vld [vmem:[%s4561_s5 + $0x78] sm:$0xff] }
 0x442   : > { %3090 = vmatprep.subr.mxu1 %v3856_v44  ;;  %3078 = vmatprep.subr.bf16.mxu0 %v3653_v0 }
 0x443   : > { %3091 = vmatpush3.msra.mxu1 %v3856_v44 }
 0x444   : > { %3092 = vmatprep.subr.mxu1 %v3864_v45 }
 0x445   : > { %3093 = vmatpush3.msra.mxu1 %v3864_v45  ;;  %3079 = vmatpush3.bf16.msra.mxu0 %v3445_v15  ;;  %v1144_v15 = vadd.f32 1e-05, %v1143_v17  ;;  %v3462_v17 = vld [vmem:[#allocation7 + $0x8] sm:$0xff]  }
 0x446   : > { %3094 = vmatprep.subr.mxu1 %v3873_v46  ;;  %3080 = vmatprep.subr.bf16.mxu0 %v3653_v0 }
 0x447   : > { %3095 = vmatpush3.msra.mxu1 %v3873_v46 }
 0x448   : > { %3096 = vmatprep.subr.mxu1 %v3882_v47 }
 0x449   : > { %3097 = vmatpush3.msra.mxu1 %v3882_v47  ;;  %3081 = vmatpush3.bf16.msra.mxu0 %v3446_v18  ;;  %v3451_v18 = vld [vmem:[#allocation7 + $0x60] sm:$0xff]  }
 0x44a   : > { %3098 = vmatprep.subr.mxu1 %v3891_v48  ;;  %3082 = vmatprep.subr.bf16.mxu0 %v3653_v0 }
 0x44b   : > { %3099 = vmatpush3.msra.mxu1 %v3891_v48 }
 0x44c   : > { %3100 = vmatprep.subr.mxu1 %v3897_v49 }
 0x44d   : > { %3101 = vmatpush3.msra.mxu1 %v3897_v49  ;;  %3083 = vmatpush3.bf16.msra.mxu0 %v3447_v19 }
 0x44e   : > { %3102 = vmatprep.subr.mxu1 %v3906_v50  ;;  %3123 = vmatprep.subr.mxu0 %v3837_v29 }
 0x44f   : > { %3103 = vmatpush3.msra.mxu1 %v3906_v50 }
 0x450   : > { %3104 = vmatprep.subr.mxu1 %v3915_v51 }
 0x451   : > { %3105 = vmatpush3.msra.mxu1 %v3915_v51 }
 0x452   : > { %3106 = vmatprep.subr.mxu1 %v3924_v52 }
 0x453   : > { %3107 = vmatpush3.msra.mxu1 %v3924_v52 }
 0x454   : > { %3108 = vmatprep.subr.mxu1 %v3933_v53 }
 0x455   : > { %3109 = vmatpush3.msra.mxu1 %v3933_v53 }
 0x456   : > { %3110 = vmatprep.subr.mxu1 %v3942_v54 }
 0x457   : > { %3111 = vmatpush3.msra.mxu1 %v3942_v54 }
 0x458   : > { %3112 = vmatprep.subr.mxu1 %v3951_v55 }
 0x459   : > { %3113 = vmatpush3.msra.mxu1 %v3951_v55 }
 0x45a   : > { %3114 = vmatprep.subr.mxu1 %v3963_v56 }
 0x45b   : > { %3115 = vmatpush3.msra.mxu1 %v3963_v56 }
 0x45c   : > { %3116 = vmatprep.subr.mxu1 %v3972_v57 }
 0x45d   : > { %3117 = vmatpush3.msra.mxu1 %v3972_v57 }
 0x45e   : > { %3118 = vmatprep.subr.mxu1 %v3981_v58 }
 0x45f   : > { %3119 = vmatpush3.msra.mxu1 %v3981_v58 }
 0x460   : > { %3158 = vmatprep.subr.bf16.mxu1 %v3653_v0 }
 0x4f8   : > { %v1345_v20 = vpop.f32.mrf.mxu1 }
 0x4fa   : > { %v3040_v21 = vpop.f32.mrf.mxu1 }
 0x4fb   : > { %v3453_v21 = vld [vmem:[#allocation7 + $0x50] sm:$0xff]  }
 0x4fc   : > { %v1348_v22 = vpop.f32.mrf.mxu1 }
 0x4fe   : > { %v3041_v1 = vpop.f32.mrf.mxu1 }
 0x500   : > { %v1475_v23 = vpop.f32.mrf.mxu1 }
 0x502   : > { %v3066_v24 = vpop.f32.mrf.mxu1 }
 0x504   : > { %v1478_v25 = vpop.f32.mrf.mxu1 }
 0x505   : > { %v1482_v26 = vpack.c.bf16 %v1478_v25, %v1475_v23 }
 0x506   : > { %v3067_v27 = vpop.f32.mrf.mxu1 }
 0x507   : > { %3085 = vmatmul.mubr.bf16.vlgmr.msra.gmra.mxu0 %v1482_v26 }
 0x508   : > { %3124 = vmatpush3.msra.mxu0 %v3837_v29  ;;  %v1435_v29 = vadd.f32 %v4152_v63, %v1345_v20  ;;  %v3452_v20 = vld [vmem:[#allocation7 + $0x58] sm:$0xff]  }
 0x509   : > { %3125 = vmatprep.subr.mxu0 %v3856_v44 }
 0x50a   : > { %3126 = vmatpush3.msra.mxu0 %v3856_v44 }
 0x50b   : > { %3127 = vmatprep.subr.mxu0 %v3864_v45 }
 0x50c   : > { %3128 = vmatpush3.msra.mxu0 %v3864_v45 }
 0x50d   : > { %3129 = vmatprep.subr.mxu0 %v3873_v46 }
 0x50e   : > { %3130 = vmatpush3.msra.mxu0 %v3873_v46 }
 0x50f   : > { %3131 = vmatprep.subr.mxu0 %v3882_v47 }
 0x510   : > { %3132 = vmatpush3.msra.mxu0 %v3882_v47  ;;  %v1438_v47 = vadd.f32 %v4154_v6, %v1348_v22 }
 0x511   : > { %3133 = vmatprep.subr.mxu0 %v3891_v48 }
 0x512   : > { %3134 = vmatpush3.msra.mxu0 %v3891_v48 }
 0x513   : > { %3135 = vmatprep.subr.mxu0 %v3897_v49 }
 0x514   : > { %3136 = vmatpush3.msra.mxu0 %v3897_v49 }
 0x515   : > { %3137 = vmatprep.subr.mxu0 %v3906_v50 }
 0x516   : > { %3138 = vmatpush3.msra.mxu0 %v3906_v50 }
 0x517   : > { %3139 = vmatprep.subr.mxu0 %v3915_v51 }
 0x518   : > { %3140 = vmatpush3.msra.mxu0 %v3915_v51 }
 0x519   : > { %3141 = vmatprep.subr.mxu0 %v3924_v52 }
 0x51a   : > { %3142 = vmatpush3.msra.mxu0 %v3924_v52 }
 0x51b   : > { %3143 = vmatprep.subr.mxu0 %v3933_v53 }
 0x51c   : > { %3144 = vmatpush3.msra.mxu0 %v3933_v53  ;;  %v3448_v53 = vld [vmem:[#allocation7 + $0x78] sm:$0xff]  }
 0x51d   : > { %3145 = vmatprep.subr.mxu0 %v3942_v54 }
 0x51e   : > { %3146 = vmatpush3.msra.mxu0 %v3942_v54  ;;  %v3449_v54 = vld [vmem:[#allocation7 + $0x70] sm:$0xff]  }
 0x51f   : > { %3147 = vmatprep.subr.mxu0 %v3951_v55 }
 0x520   : > { %3148 = vmatpush3.msra.mxu0 %v3951_v55  ;;  %v3450_v55 = vld [vmem:[#allocation7 + $0x68] sm:$0xff]  }
 0x521   : > { %3149 = vmatprep.subr.mxu0 %v3963_v56 }
 0x522   : > { %3150 = vmatpush3.msra.mxu0 %v3963_v56 }
 0x523   : > { %3151 = vmatprep.subr.mxu0 %v3972_v57 }
 0x524   : > { %3152 = vmatpush3.msra.mxu0 %v3972_v57 }
 0x525   : > { %3153 = vmatprep.subr.mxu0 %v3981_v58 }
 0x526   : > { %3154 = vmatpush3.msra.mxu0 %v3981_v58 }
 0x527   : > { %3184 = vmatprep.subr.bf16.mxu0 %v3653_v0 }
 0x5c7   : > { %v1582_v44 = vpop.f32.mrf.mxu0 }
 0x5c8   : > { %v4230_v45 = vadd.f32 %v1582_v44, %v1435_v29 }
 0x5c9   : > { %v3086_v46 = vpop.f32.mrf.mxu0 }
 0x5ca   : > { %3120 = vmatprep.mubr.f32.mxu1 %v4230_v45  ;;  %v1666_v48 = vmul.f32 %v4230_v45, %v4230_v45 }
 0x5cb   : > { %v1585_v49 = vpop.f32.mrf.mxu0 }
 0x5cc   : > { %v4236_v50 = vadd.f32 %v1585_v49, %v1438_v47  ;;  %3155 = vmatprep.mubr.f32.mxu0 %v1666_v48  ;;  %v1782_v49 = vld [vmem:[%s4562_s6 + $0x3] sm:$0x1] }
 0x5cd   : > { %v3087_v51 = vpop.f32.mrf.mxu0 }
 0x5ce   : > { %v1667_v52 = vmul.f32 %v4236_v50, %v4236_v50  ;;  %3121 = vmatmul.mubr.f32.vlgmr.msra.gmra.mxu1 %v4236_v50 }
 0x5cf   : > { %3160 = vmatprep.mubr.msk.bf16.mxu1 %vm3654_vm0, %v3653_v0 }
 0x5d0   : > { %3156 = vmatmul.mubr.f32.vlgmr.msra.gmra.mxu0 %v1667_v52 }
 0x5d1   : > { %3200 = vmatprep.mubr.msk.bf16.mxu0 %vm3654_vm0, %v3653_v0  ;;  %3185 = vmatpush3.bf16.msra.mxu0 %v3448_v53 }
 0x5d2   : > { %3186 = vmatprep.subr.bf16.mxu0 %v3653_v0 }
 0x5d5   : > { %3187 = vmatpush3.bf16.msra.mxu0 %v3449_v54 }
 0x5d6   : > { %3188 = vmatprep.subr.bf16.mxu0 %v3653_v0 }
 0x5d9   : > { %3189 = vmatpush3.bf16.msra.mxu0 %v3450_v55 }
 0x5da   : > { %3190 = vmatprep.subr.bf16.mxu0 %v3653_v0 }
 0x5dd   : > { %3191 = vmatpush3.bf16.msra.mxu0 %v3451_v18 }
 0x5de   : > { %3192 = vmatprep.subr.bf16.mxu0 %v3653_v0 }
 0x5e1   : > { %3193 = vmatpush3.bf16.msra.mxu0 %v3452_v20 }
 0x5e2   : > { %3194 = vmatprep.subr.bf16.mxu0 %v3653_v0 }
 0x5e5   : > { %3195 = vmatpush3.bf16.msra.mxu0 %v3453_v21 }
 0x5e6   : > { %3196 = vmatprep.subr.bf16.mxu0 %v3653_v0 }
 0x5e9   : > { %3197 = vmatpush3.bf16.msra.mxu0 %v3454_v38 }
 0x5ea   : > { %3198 = vmatprep.subr.bf16.mxu0 %v3653_v0 }
 0x5ed   : > { %3199 = vmatpush3.bf16.msra.mxu0 %v3455_v39 }
 0x5ee   : > { %3230 = vmatprep.subr.mxu0 %v4264_v40 }
 0x68e   : > { %v3122_v56 = vpop.f32.mrf.mxu1 }
 0x68f   : > { %v1744_v28 = vsel %vm894_vm3, %v3122_v56, 0.0 }
 0x690   : > { %v1657_v57 = vpop.f32.mrf.mxu1  ;;  %v3157_v58 = vpop.f32.mrf.mxu0 }
 0x691   : > { %v1743_v30 = vsel %vm894_vm3, %v1657_v57, 0.0  ;;  %v1753_v33 = vsel %vm894_vm3, %v3157_v58, 0.0 }
 0x692   : > { %v1745_v31 = vadd.f32 %v1744_v28, %v1743_v30  ;;  %v1734_v32 = vpop.f32.mrf.mxu0 }
 0x693   : > { %v1752_v2 = vsel %vm894_vm3, %v1734_v32, 0.0 }
 0x694   : > { %v1746_v9 = vrot.slane %v1745_v31, 4  ;;  %v1754_v34 = vadd.f32 %v1753_v33, %v1752_v2  ;;  %v3456_v2 = vld [vmem:[#allocation7 + $0x38] sm:$0xff]  }
 0x696   : > { %v1747_v36 = vadd.f32 %v1746_v9, %v1745_v31  ;;  %v1755_v3 = vrot.slane %v1754_v34, 4  ;;  %v3457_v9 = vld [vmem:[#allocation7 + $0x30] sm:$0xff]  }
 0x698   : > { %v1748_v37 = vrot.slane %v1747_v36, 2  ;;  %v1756_v41 = vadd.f32 %v1755_v3, %v1754_v34  ;;  %v4304_v34 = vld [vmem:[%s4561_s5 + $0x68] sm:$0xff] }
 0x699   : > { %v3458_v3 = vld [vmem:[#allocation7 + $0x28] sm:$0xff]  }
 0x69a   : > { %v1749_v42 = vadd.f32 %v1748_v37, %v1747_v36  ;;  %v1757_v43 = vrot.slane %v1756_v41, 2  ;;  %v4311_v36 = vld [vmem:[%s4561_s5 + $0x60] sm:$0xff]  ;;  %v4319_v37 = vld [vmem:[%s4561_s5 + $0x58] sm:$0xff] }
 0x69c   : > { %v1750_v59 = vrot.slane %v1749_v42, 1  ;;  %v1758_v60 = vadd.f32 %v1757_v43, %v1756_v41  ;;  %v4326_v41 = vld [vmem:[%s4561_s5 + $0x50] sm:$0xff]  ;;  %v4334_v43 = vld [vmem:[%s4561_s5 + $0x48] sm:$0xff] }
 0x69e   : > { %v1751_v63 = vadd.f32 %v1750_v59, %v1749_v42  ;;  %v1759_v4 = vrot.slane %v1758_v60, 1  ;;  %v3459_v42 = vld [vmem:[#allocation7 + $0x20] sm:$0xff]  }
 0x69f   : > { %v4341_v59 = vld [vmem:[%s4561_s5 + $0x40] sm:$0xff] }
 0x6a0   : > { %v1761_v5 = vmul.f32 0.0009765625, %v1751_v63  ;;  %v1760_v6 = vadd.f32 %v1759_v4, %v1758_v60  ;;  %v3460_v60 = vld [vmem:[#allocation7 + $0x18] sm:$0xff]   ;;  %v4356_v4 = vld [vmem:[%s4561_s5 + $0x30] sm:$0xff] }
 0x6a1   : > { %v4349_v63 = vld [vmem:[%s4561_s5 + $0x38] sm:$0xff] }
 0x6a2   : > { %v1762_v7 = vmul.f32 0.0009765625, %v1760_v6  ;;  %v1763_v8 = vmul.f32 %v1761_v5, %v1761_v5  ;;  %v4364_v6 = vld [vmem:[%s4561_s5 + $0x28] sm:$0xff] }
 0x6a4   : > { %v1764_v11 = vsub.f32 %v1762_v7, %v1763_v8  ;;  %v4371_v7 = vld [vmem:[%s4561_s5 + $0x20] sm:$0xff]  ;;  %v4379_v8 = vld [vmem:[%s4561_s5 + $0x18] sm:$0xff] }
 0x6a6   : > { %v1765_v12 = vmax.f32 %v1764_v11, 0.0  ;;  %v4386_v11 = vld [vmem:[%s4561_s5 + $0x10] sm:$0xff] }
 0x6a8   : > { %v1766_v14 = vadd.f32 1e-05, %v1765_v12  ;;  %v4393_v12 = vld [vmem:[%s4561_s5 + $0x8] sm:$0xff] }
 0x6aa   : > { %3474 = vrsqrt.f32 %v1766_v14  ;;  %v4400_v14 = vld [vmem:[%s4561_s5] sm:$0xff] }
 0x6ab   : > { %3476 = vrsqrt.f32 %v1144_v15  ;;  %v3463_v15 = vld [vmem:[#allocation7] sm:$0xff]  }
 0x6b7   : > { %v3475_v19 = vpop.eup %3474 }
 0x6b8   : > { %1775 = vperm.xlu0 %3381, %v3475_v19   ;;  %1770 = vperm.xlu1 %3384, %v3475_v19   ;;  %v3477_v22 = vpop.eup %3476 }
 0x6bc   : > { %1790 = vperm.xlu0 %3381, %v1761_v5   ;;  %1785 = vperm.xlu1 %3384, %v1761_v5   ;;  %v3461_v5 = vld [vmem:[#allocation7 + $0x10] sm:$0xff]  }
 0x6c0   : > { %1153 = vperm.xlu0 %3381, %v3477_v22   ;;  %1148 = vperm.xlu1 %3384, %v3477_v22  }
 0x6c4   : > { %1168 = vperm.xlu0 %3381, %v4095_v35   ;;  %1163 = vperm.xlu1 %3384, %v4095_v35   ;;  %v1780_v35 = vld [vmem:[%s4562_s6 + $0x2] sm:$0x1] }
 0x733   : > { %v1776_v1 = vpop.permute.xlu0 %1775  ;;  %v1771_v23 = vpop.permute.xlu1 %1770 }
 0x734   : > { %v1778_v24 = vmul.f32 %v1776_v1, %v4115_v62  ;;  %v1773_v25 = vmul.f32 %v1771_v23, %v4112_v61 }
 0x736   : > { %v1779_v26 = vadd.f32 %v1778_v24, %v1773_v25  ;;  %v3464_v24 = vld [vmem:[#allocation7 + $0xb8] sm:$0xff]   ;;  %v3497_v25 = vld [vmem:[%s4560_s4 + $0x8] sm:$0xff]  }
 0x737   : > { %v1791_v27 = vpop.permute.xlu0 %1790  ;;  %v1786_v29 = vpop.permute.xlu1 %1785 }
 0x738   : > { %v1781_v44 = vmul.f32 %v1780_v35, %v1779_v26  ;;  %v1793_v46 = vmul.f32 %v1791_v27, %v4115_v62  ;;  %v1788_v47 = vmul.f32 %v1786_v29, %v4112_v61  ;;  %v3465_v35 = vld [vmem:[#allocation7 + $0xb0] sm:$0xff]   ;;  %v3466_v26 = vld [vmem:[#allocation7 + $0xa8] sm:$0xff]   ;;  %v3467_v27 = vld [vmem:[#allocation7 + $0xa0] sm:$0xff]  }
 0x739   : > { %v3468_v29 = vld [vmem:[#allocation7 + $0x98] sm:$0xff]  }
 0x73a   : > { %v1794_v48 = vadd.f32 %v1793_v46, %v1788_v47  ;;  %v1800_v51 = vrot.slane %v1781_v44, %v4124_v13  ;;  %v3470_v46 = vld [vmem:[#allocation7 + $0x88] sm:$0xff]   ;;  %v3471_v47 = vld [vmem:[#allocation7 + $0x80] sm:$0xff]  }
 0x73c   : > { %v1795_v52 = vmul.f32 %v1794_v48, %v1781_v44  ;;  %v1801_v54 = vmul.f32 %v1800_v51, %v4230_v45  ;;  %v1802_v55 = vmul.f32 %v1800_v51, %v4236_v50  ;;  %v4290_v45 = vld [vmem:[%s4561_s5 + $0x70] sm:$0xff]  ;;  %v3482_v50 = vld [vmem:[%s4560_s4] sm:$0xff]  }
 0x73d   : > { %v3469_v44 = vld [vmem:[#allocation7 + $0x90] sm:$0xff]  }
 0x73e   : > { %v1796_v53 = vsub.f32 %v1782_v49, %v1795_v52 }
 0x740   : > { %v1806_v56 = vrot.slane %v1796_v53, %v4124_v13 }
 0x742   : > { %v1807_v57 = vadd.f32 %v1806_v56, %v1801_v54  ;;  %v1808_v58 = vadd.f32 %v1806_v56, %v1802_v55 }
 0x744   : > { %vm1809_vm6 = vcmp.ge.f32.partialorder %v1807_v57, 0.0  ;;  %vm1810_vm7 = vcmp.ge.f32.partialorder %v1808_v58, 0.0  ;;  %v1811_v28 = vmul.f32 0.1, %v1807_v57  ;;  %v1812_v30 = vmul.f32 0.1, %v1808_v58 }
 0x746   : > { %v1813_v31 = vsel %vm1809_vm6, %v1807_v57, %v1811_v28  ;;  %v1814_v32 = vsel %vm1810_vm7, %v1808_v58, %v1812_v30 }
 0x747   : > { %v4281_v33 = vpack.c.bf16 %v1814_v32, %v1813_v31 }
 0x749   : > { %3159 = vmatpush3.bf16.msra.mxu1 %v4281_v33  ;;  %3201 = vmatmul.mubr.bf16.vlgmr.msra.gmra.mxu0 %v4281_v33 }
 0x74a   : > { %3164 = vmatprep.subr.bf16.mxu1 %v3653_v0  ;;  %3231 = vmatpush3.msra.mxu0 %v4264_v40 }
 0x74b   : > { %3232 = vmatprep.subr.mxu0 %v4290_v45 }
 0x74c   : > { %3161 = vmatmul.mubr.msk.bf16.vlgmr.msra.gmra.mxu1 %vm347_vm1, %v3482_v50  ;;  %3233 = vmatpush3.msra.mxu0 %v4290_v45 }
 0x74d   : > { %3165 = vmatpush3.bf16.msra.mxu1 %v3456_v2  ;;  %3180 = vmatprep.mubr.msk.bf16.mxu1 %vm3654_vm0, %v3653_v0 }
 0x74e   : > { %3166 = vmatprep.subr.bf16.mxu1 %v3653_v0  ;;  %3234 = vmatprep.subr.mxu0 %v4304_v34 }
 0x74f   : > { %3235 = vmatpush3.msra.mxu0 %v4304_v34 }
 0x750   : > { %3236 = vmatprep.subr.mxu0 %v4311_v36 }
 0x751   : > { %3167 = vmatpush3.bf16.msra.mxu1 %v3457_v9  ;;  %3237 = vmatpush3.msra.mxu0 %v4311_v36 }
 0x752   : > { %3168 = vmatprep.subr.bf16.mxu1 %v3653_v0  ;;  %3238 = vmatprep.subr.mxu0 %v4319_v37 }
 0x753   : > { %3239 = vmatpush3.msra.mxu0 %v4319_v37 }
 0x754   : > { %3240 = vmatprep.subr.mxu0 %v4326_v41 }
 0x755   : > { %3169 = vmatpush3.bf16.msra.mxu1 %v3458_v3  ;;  %3241 = vmatpush3.msra.mxu0 %v4326_v41 }
 0x756   : > { %3170 = vmatprep.subr.bf16.mxu1 %v3653_v0  ;;  %3242 = vmatprep.subr.mxu0 %v4334_v43 }
 0x757   : > { %3243 = vmatpush3.msra.mxu0 %v4334_v43 }
 0x758   : > { %3244 = vmatprep.subr.mxu0 %v4341_v59 }
 0x759   : > { %3171 = vmatpush3.bf16.msra.mxu1 %v3459_v42  ;;  %3245 = vmatpush3.msra.mxu0 %v4341_v59 }
 0x75a   : > { %3172 = vmatprep.subr.bf16.mxu1 %v3653_v0  ;;  %3246 = vmatprep.subr.mxu0 %v4349_v63 }
 0x75b   : > { %3247 = vmatpush3.msra.mxu0 %v4349_v63 }
 0x75c   : > { %3248 = vmatprep.subr.mxu0 %v4356_v4 }
 0x75d   : > { %3173 = vmatpush3.bf16.msra.mxu1 %v3460_v60  ;;  %3249 = vmatpush3.msra.mxu0 %v4356_v4 }
 0x75e   : > { %3174 = vmatprep.subr.bf16.mxu1 %v3653_v0  ;;  %3250 = vmatprep.subr.mxu0 %v4364_v6 }
 0x75f   : > { %3251 = vmatpush3.msra.mxu0 %v4364_v6 }
 0x760   : > { %3252 = vmatprep.subr.mxu0 %v4371_v7 }
 0x761   : > { %3175 = vmatpush3.bf16.msra.mxu1 %v3461_v5  ;;  %3253 = vmatpush3.msra.mxu0 %v4371_v7 }
 0x762   : > { %3176 = vmatprep.subr.bf16.mxu1 %v3653_v0  ;;  %3254 = vmatprep.subr.mxu0 %v4379_v8 }
 0x763   : > { %3255 = vmatpush3.msra.mxu0 %v4379_v8 }
 0x764   : > { %3256 = vmatprep.subr.mxu0 %v4386_v11 }
 0x765   : > { %3257 = vmatpush3.msra.mxu0 %v4386_v11  ;;  %3177 = vmatpush3.bf16.msra.mxu1 %v3462_v17 }
 0x766   : > { %3258 = vmatprep.subr.mxu0 %v4393_v12  ;;  %3178 = vmatprep.subr.bf16.mxu1 %v3653_v0 }
 0x767   : > { %3259 = vmatpush3.msra.mxu0 %v4393_v12 }
 0x768   : > { %3260 = vmatprep.subr.mxu0 %v4400_v14 }
 0x769   : > { %3261 = vmatpush3.msra.mxu0 %v4400_v14  ;;  %3179 = vmatpush3.bf16.msra.mxu1 %v3463_v15 }
 0x76a   : > { %3204 = vmatprep.subr.bf16.mxu1 %v3653_v0 }
 0x809   : > { %v4406_v18 = vpop.f32.mrf.mxu0 }
 0x80b   : > { %v3202_v19 = vpop.f32.mrf.mxu0 }
 0x80c   : > { %v1867_v20 = vpop.f32.mrf.mxu1 }
 0x80d   : > { %v4408_v21 = vpop.f32.mrf.mxu0 }
 0x80e   : > { %v3162_v22 = vpop.f32.mrf.mxu1 }
 0x80f   : > { %v3203_v38 = vpop.f32.mrf.mxu0 }
 0x810   : > { %v1870_v39 = vpop.f32.mrf.mxu1 }
 0x811   : > { %v1874_v1 = vpack.c.bf16 %v1870_v39, %v1867_v20 }
 0x812   : > { %v3163_v23 = vpop.f32.mrf.mxu1 }
 0x813   : > { %3181 = vmatmul.mubr.bf16.vlgmr.msra.gmra.mxu1 %v1874_v1  ;;  %v1154_v1 = vpop.permute.xlu0 %1153  ;;  %v1149_v23 = vpop.permute.xlu1 %1148 }
 0x814   : > { %3205 = vmatpush3.bf16.msra.mxu1 %v4281_v33  ;;  %3206 = vmatprep.mubr.msk.bf16.mxu1 %vm3654_vm0, %v3653_v0 }
 0x815   : > { %3210 = vmatprep.subr.bf16.mxu1 %v3653_v0 }
 0x81b   : > { %3207 = vmatmul.mubr.msk.bf16.vlgmr.msra.gmra.mxu1 %vm347_vm1, %v3497_v25  ;;  %v1164_v25 = vpop.permute.xlu1 %1163 }
 0x81c   : > { %3211 = vmatpush3.bf16.msra.mxu1 %v3464_v24  ;;  %3226 = vmatprep.mubr.msk.bf16.mxu1 %vm3654_vm0, %v3653_v0  ;;  %v1169_v24 = vpop.permute.xlu0 %1168 }
 0x81d   : > { %3212 = vmatprep.subr.bf16.mxu1 %v3653_v0 }
 0x820   : > { %3213 = vmatpush3.bf16.msra.mxu1 %v3465_v35  ;;  %v1156_v35 = vmul.f32 %v1154_v1, %v4115_v62 }
 0x821   : > { %3214 = vmatprep.subr.bf16.mxu1 %v3653_v0 }
 0x824   : > { %3215 = vmatpush3.bf16.msra.mxu1 %v3466_v26  ;;  %v1151_v26 = vmul.f32 %v1149_v23, %v4112_v61 }
 0x825   : > { %3216 = vmatprep.subr.bf16.mxu1 %v3653_v0 }
 0x828   : > { %3217 = vmatpush3.bf16.msra.mxu1 %v3467_v27  ;;  %v1171_v27 = vmul.f32 %v1169_v24, %v4115_v62 }
 0x829   : > { %3218 = vmatprep.subr.bf16.mxu1 %v3653_v0 }
 0x82c   : > { %3219 = vmatpush3.bf16.msra.mxu1 %v3468_v29  ;;  %v1166_v29 = vmul.f32 %v1164_v25, %v4112_v61 }
 0x82d   : > { %3220 = vmatprep.subr.bf16.mxu1 %v3653_v0 }
 0x830   : > { %3221 = vmatpush3.bf16.msra.mxu1 %v3469_v44  ;;  %v1157_v44 = vadd.f32 %v1156_v35, %v1151_v26 }
 0x831   : > { %3222 = vmatprep.subr.bf16.mxu1 %v3653_v0 }
 0x834   : > { %3223 = vmatpush3.bf16.msra.mxu1 %v3470_v46  ;;  %v1158_v46 = vld [vmem:[%s4562_s6 + $0x6] sm:$0x1] }
 0x835   : > { %3224 = vmatprep.subr.bf16.mxu1 %v3653_v0 }
 0x838   : > { %3225 = vmatpush3.bf16.msra.mxu1 %v3471_v47  ;;  %v1172_v47 = vadd.f32 %v1171_v27, %v1166_v29 }
 0x839   : > { %3265 = vmatprep.subr.mxu1 %v4264_v40 }
 0x8d3   : > { %v1973_v48 = vpop.f32.mrf.mxu1 }
 0x8d4   : > { %v2063_v0 = vadd.f32 %v4406_v18, %v1973_v48 }
 0x8d5   : > { %v3182_v49 = vpop.f32.mrf.mxu1 }
 0x8d7   : > { %v1976_v51 = vpop.f32.mrf.mxu1 }
 0x8d8   : > { %v2066_v30 = vadd.f32 %v4408_v21, %v1976_v51  ;;  %v1159_v51 = vmul.f32 %v1158_v46, %v1157_v44 }
 0x8d9   : > { %v3183_v52 = vpop.f32.mrf.mxu1 }
 0x8db   : > { %v2103_v53 = vpop.f32.mrf.mxu1 }
 0x8dd   : > { %v3208_v54 = vpop.f32.mrf.mxu1 }
 0x8de   : > { %v2408_v54 = vld [vmem:[%s4562_s6 + $0x4] sm:$0x1] }
 0x8df   : > { %v2106_v55 = vpop.f32.mrf.mxu1 }
 0x8e0   : > { %v2110_v56 = vpack.c.bf16 %v2106_v55, %v2103_v53  ;;  %v1173_v55 = vmul.f32 %v1172_v47, %v1159_v51 }
 0x8e1   : > { %v3209_v57 = vpop.f32.mrf.mxu1 }
 0x8e2   : > { %3227 = vmatmul.mubr.bf16.vlgmr.msra.gmra.mxu1 %v2110_v56  ;;  %v1160_v57 = vld [vmem:[%s4562_s6 + $0x7] sm:$0x1] }
 0x8e3   : > { %3266 = vmatpush3.msra.mxu1 %v4264_v40 }
 0x8e4   : > { %3267 = vmatprep.subr.mxu1 %v4290_v45 }
 0x8e5   : > { %3268 = vmatpush3.msra.mxu1 %v4290_v45 }
 0x8e6   : > { %3269 = vmatprep.subr.mxu1 %v4304_v34 }
 0x8e7   : > { %3270 = vmatpush3.msra.mxu1 %v4304_v34 }
 0x8e8   : > { %3271 = vmatprep.subr.mxu1 %v4311_v36 }
 0x8e9   : > { %3272 = vmatpush3.msra.mxu1 %v4311_v36 }
 0x8ea   : > { %3273 = vmatprep.subr.mxu1 %v4319_v37 }
 0x8eb   : > { %3274 = vmatpush3.msra.mxu1 %v4319_v37 }
 0x8ec   : > { %3275 = vmatprep.subr.mxu1 %v4326_v41 }
 0x8ed   : > { %3276 = vmatpush3.msra.mxu1 %v4326_v41 }
 0x8ee   : > { %3277 = vmatprep.subr.mxu1 %v4334_v43 }
 0x8ef   : > { %3278 = vmatpush3.msra.mxu1 %v4334_v43 }
 0x8f0   : > { %3279 = vmatprep.subr.mxu1 %v4341_v59 }
 0x8f1   : > { %3280 = vmatpush3.msra.mxu1 %v4341_v59 }
 0x8f2   : > { %3281 = vmatprep.subr.mxu1 %v4349_v63 }
 0x8f3   : > { %3282 = vmatpush3.msra.mxu1 %v4349_v63 }
 0x8f4   : > { %3283 = vmatprep.subr.mxu1 %v4356_v4 }
 0x8f5   : > { %3284 = vmatpush3.msra.mxu1 %v4356_v4 }
 0x8f6   : > { %3285 = vmatprep.subr.mxu1 %v4364_v6 }
 0x8f7   : > { %3286 = vmatpush3.msra.mxu1 %v4364_v6 }
 0x8f8   : > { %3287 = vmatprep.subr.mxu1 %v4371_v7 }
 0x8f9   : > { %3288 = vmatpush3.msra.mxu1 %v4371_v7 }
 0x8fa   : > { %3289 = vmatprep.subr.mxu1 %v4379_v8 }
 0x8fb   : > { %3290 = vmatpush3.msra.mxu1 %v4379_v8 }
 0x8fc   : > { %3291 = vmatprep.subr.mxu1 %v4386_v11 }
 0x8fd   : > { %3292 = vmatpush3.msra.mxu1 %v4386_v11 }
 0x8fe   : > { %3293 = vmatprep.subr.mxu1 %v4393_v12 }
 0x8ff   : > { %3294 = vmatpush3.msra.mxu1 %v4393_v12 }
 0x900   : > { %3295 = vmatprep.subr.mxu1 %v4400_v14 }
 0x901   : > { %3296 = vmatpush3.msra.mxu1 %v4400_v14 }
 0x9a2   : > { %v2210_v40 = vpop.f32.mrf.mxu1 }
 0x9a3   : > { %v4460_v58 = vadd.f32 %v2210_v40, %v2063_v0 }
 0x9a4   : > { %v3228_v28 = vpop.f32.mrf.mxu1 }
 0x9a5   : > { %3262 = vmatprep.mubr.f32.mxu0 %v4460_v58  ;;  %v2294_v31 = vmul.f32 %v4460_v58, %v4460_v58 }
 0x9a6   : > { %v2213_v32 = vpop.f32.mrf.mxu1 }
 0x9a7   : > { %v4466_v33 = vadd.f32 %v2213_v32, %v2066_v30  ;;  %3297 = vmatprep.mubr.f32.mxu1 %v2294_v31  ;;  %v1174_v32 = vsub.f32 %v1160_v57, %v1173_v55 }
 0x9a8   : > { %v3229_v2 = vpop.f32.mrf.mxu1 }
 0x9a9   : > { %v2295_v45 = vmul.f32 %v4466_v33, %v4466_v33  ;;  %3263 = vmatmul.mubr.f32.vlgmr.msra.gmra.mxu0 %v4466_v33 }
 0x9ab   : > { %3298 = vmatmul.mubr.f32.vlgmr.msra.gmra.mxu1 %v2295_v45  ;;  %v1178_v45 = vrot.slane %v1159_v51, %v4124_v13 }
 0xa69   : > { %v3264_v50 = vpop.f32.mrf.mxu0 }
 0xa6a   : > { %v2372_v36 = vsel %vm894_vm3, %v3264_v50, 0.0  ;;  %v2410_v50 = vld [vmem:[%s4562_s6 + $0x5] sm:$0x1] }
 0xa6b   : > { %v2285_v9 = vpop.f32.mrf.mxu0  ;;  %v3299_v34 = vpop.f32.mrf.mxu1 }
 0xa6c   : > { %v2371_v3 = vsel %vm894_vm3, %v2285_v9, 0.0  ;;  %v2381_v42 = vsel %vm894_vm3, %v3299_v34, 0.0 }
 0xa6d   : > { %v2373_v37 = vadd.f32 %v2372_v36, %v2371_v3  ;;  %v2362_v41 = vpop.f32.mrf.mxu1  ;;  %v1184_v36 = vrot.slane %v1174_v32, %v4124_v13 }
 0xa6e   : > { %v2380_v43 = vsel %vm894_vm3, %v2362_v41, 0.0 }
 0xa6f   : > { %v2374_v59 = vrot.slane %v2373_v37, 4  ;;  %v2382_v60 = vadd.f32 %v2381_v42, %v2380_v43 }
 0xa71   : > { %v2375_v63 = vadd.f32 %v2374_v59, %v2373_v37  ;;  %v2383_v4 = vrot.slane %v2382_v60, 4 }
 0xa73   : > { %v2376_v5 = vrot.slane %v2375_v63, 2  ;;  %v2384_v6 = vadd.f32 %v2383_v4, %v2382_v60 }
 0xa75   : > { %v2377_v7 = vadd.f32 %v2376_v5, %v2375_v63  ;;  %v2385_v8 = vrot.slane %v2384_v6, 2 }
 0xa77   : > { %v2378_v11 = vrot.slane %v2377_v7, 1  ;;  %v2386_v12 = vadd.f32 %v2385_v8, %v2384_v6 }
 0xa79   : > { %v2379_v14 = vadd.f32 %v2378_v11, %v2377_v7  ;;  %v2387_v17 = vrot.slane %v2386_v12, 1 }
 0xa7b   : > { %v2389_v15 = vmul.f32 0.0009765625, %v2379_v14  ;;  %v2388_v18 = vadd.f32 %v2387_v17, %v2386_v12 }
 0xa7d   : > { %v2390_v19 = vmul.f32 0.0009765625, %v2388_v18  ;;  %v2391_v20 = vmul.f32 %v2389_v15, %v2389_v15 }
 0xa7f   : > { %v2392_v21 = vsub.f32 %v2390_v19, %v2391_v20 }
 0xa81   : > { %v2393_v22 = vmax.f32 %v2392_v21, 0.0 }
 0xa83   : > { %v2394_v38 = vadd.f32 1e-05, %v2393_v22 }
 0xa85   : > { %3478 = vrsqrt.f32 %v2394_v38 }
 0xa92   : > { %v3479_v39 = vpop.eup %3478 }
 0xa93   : > { %2403 = vperm.xlu0 %3381, %v3479_v39   ;;  %2398 = vperm.xlu1 %3384, %v3479_v39  }
 0xa97   : > { %2418 = vperm.xlu0 %3381, %v2389_v15   ;;  %2413 = vperm.xlu1 %3384, %v2389_v15  }
 0xb0e   : > { %v2404_v48 = vpop.permute.xlu0 %2403  ;;  %v2399_v49 = vpop.permute.xlu1 %2398 }
 0xb0f   : > { %v2406_v52 = vmul.f32 %v2404_v48, %v4115_v62  ;;  %v2401_v53 = vmul.f32 %v2399_v49, %v4112_v61 }
 0xb11   : > { %v2407_v56 = vadd.f32 %v2406_v52, %v2401_v53 }
 0xb12   : > { %v2419_v0 = vpop.permute.xlu0 %2418  ;;  %v2414_v40 = vpop.permute.xlu1 %2413 }
 0xb13   : > { %v2409_v28 = vmul.f32 %v2408_v54, %v2407_v56  ;;  %v2421_v30 = vmul.f32 %v2419_v0, %v4115_v62  ;;  %v2416_v31 = vmul.f32 %v2414_v40, %v4112_v61  ;;  %v1179_v62 = vmul.f32 %v1178_v45, %v4000_v10 }
 0xb14   : > { %v1180_v61 = vmul.f32 %v1178_v45, %v4062_v16 }
 0xb15   : > { %v2422_v2 = vadd.f32 %v2421_v30, %v2416_v31  ;;  %v2428_v9 = vrot.slane %v2409_v28, %v4124_v13  ;;  %v1185_v43 = vadd.f32 %v1184_v36, %v1179_v62 }
 0xb16   : > { %v1186_v59 = vadd.f32 %v1184_v36, %v1180_v61 }
 0xb17   : > { %v2423_v34 = vmul.f32 %v2422_v2, %v2409_v28  ;;  %v2429_v37 = vmul.f32 %v2428_v9, %v4460_v58  ;;  %v2430_v41 = vmul.f32 %v2428_v9, %v4466_v33 }
 0xb19   : > { %v2424_v3 = vsub.f32 %v2410_v50, %v2423_v34 }
 0xb1b   : > { %v2434_v42 = vrot.slane %v2424_v3, %v4124_v13 }
 0xb1d   : > { %v2435_v60 = vadd.f32 %v2434_v42, %v2429_v37  ;;  %v2436_v63 = vadd.f32 %v2434_v42, %v2430_v41 }
 0xb1f   : > { %v2437_v10 = vadd.f32 %v2435_v60, %v1185_v43  ;;  %v2438_v16 = vadd.f32 %v2436_v63, %v1186_v59 }
 0xb21   : > { %2439 = vst [vmem:[%s315_s13] sm:$0xff] %v2437_v10  ;;  %2440 = vst [vmem:[%s315_s13 + $0x8] sm:$0xff] %v2438_v16 }
 0xb22   : > { %3589 = shalt.err (!%p3586_p0)
}
 0xb23   : > { %s3590_s15 = scalar_lea.hbm %s4510_s29, 256  ;;  %s3594_s18 = scalar_lea.hbm %s4563_s7, 512 }
 0xb24   : > { %p3591_p1 = scmp.ne.s32.totalorder %s4510_s29, %s3590_s15  ;;  %p3595_p4 = scmp.lt.s32.totalorder %s4510_s29, %s4563_s7 }
 0xb25   : > { %p3596_p13 = scmp.lt.s32.totalorder %s3594_s18, %s3590_s15 }
 0xb26   : > { %p3592_p2 = pnand %p3591_p1, %p3738_p5 }
 0xb27   : > { %p3597_p9 = por %p3596_p13, %p3595_p4 }
 0xb28   : > { %p3593_p3 = pneg %p3592_p2 }
 0xb2a   : > { %p3598_p10 = pnand %p3597_p9, %p3593_p3 }
 0xb2c   : > { %3601 = shalt.err (!%p3598_p10)
}
 0xb2d   : > { %s3658_s20 = smov 128   ;;  %s3659_s21 = smov 8  }
 0xb2e   : > { %3312 = dma.vmem_to_hbm [thread:$0]  (%p3738_p5), %s4512_s16, 256, %s4510_s29, %s4516_s28, %s3658_s20, %s3658_s20, %s3659_s21  }
 0xb2f PF: > { %p3334_p12 = scmp.ge.s32.totalorder %s3644_s27, 2  ;;  %s2470_s8 = sand.u32 1, %s3632_s24  }
 0xb30   : > { %s2471_s9 = scalar_lea.sflag [#allocation4], %s2470_s8 }
 0xb31   : > { %p3325_p7 = pnand %p3334_p12, %p3742_p6 }
 0xb33   : > { %p3326_p8 = pneg %p3325_p7 }
 0xb35   : > { %3627 = dma.done.wait (%p3326_p8), %s2471_s9, 256  }
 0xb36   : > { %3629 = vsyncadd (%p3326_p8), %s2471_s9, 4294967040  ;;  %p19_p11 = scmp.ge.s32.totalorder %s3725_s30, 4   ;;  %s4568_s24 = smov %s3636_s25 }
 0xb37   : > { %s4569_s25 = smov %s3640_s26  ;;  %s4570_s26 = smov %s3736_s10 }
 0xb38   : > { %s4571_s27 = smov %s3725_s30  ;;  %21 = sbr.rel (!%p19_p11) target bundleno = 5 (0x5), region = 103 }
 0xb3d   :  { %2476 = vsyncpa [#allocation3], 1 }
 0xb3e   :  { %2478 = vsyncpa [#allocation3 + $0x1], 1 }
 0xb3f   :  { %2479 = vsyncpa [#allocation6], 1 }
 0xb40   :  { %2480 = vsyncpa [#allocation4], 1 }
 0xb41   :  { %2482 = vsyncpa [#allocation4 + $0x1], 1 }

</bundles_post_ra>
